<compile_context>
chip_gen: v6e
topology: v6e:2x2x1
jax: 0.10.0
libtpu: 0.0.40
codegen_flags: <defaults>
</compile_context>

<pallas_src>
import math
import jax
import jax.numpy as jnp
from jax import lax
from jax.experimental import pallas as pl
from jax.experimental.pallas import tpu as pltpu


def _sigmoid(x):
    # Same explicit formula in kernel and reference.
    return 1.0 / (1.0 + jnp.exp(-x))


def _round_up(x, m):
    return m * ((x + m - 1) // m)


def gru_kernel(x_ref, wih_ref, bias_ref, whh_ref, bhhn_ref, wfc_ref, bfc_ref,
               out_ref, h_ref, gi_ref):
    c = pl.program_id(1)  # time-chunk axis (inner, "arbitrary")

    @pl.when(c == 0)
    def _():
        h_ref[...] = jnp.zeros_like(h_ref)

    tc, bb, _ = x_ref.shape
    hp = h_ref.shape[1]

    # Resident weights / biases loaded once per grid step; broadcasts hoisted
    # out of the time loops (JAX does not CSE broadcast_in_dim).
    wih = wih_ref[...]                                         # (F, 3Hp)
    whh = whh_ref[...]                                         # (Hp, 3Hp)
    bias = jnp.broadcast_to(bias_ref[...], (bb, 3 * hp))       # b_ih (+ b_hh r/z)
    bhhn = jnp.broadcast_to(bhhn_ref[...], (bb, hp))           # b_hh n-gate

    unroll = min(tc, 8)

    # --- Phase 1: input projection for the whole chunk (independent of h) ----
    def proj(t, carry):
        gi_ref[t] = (jnp.dot(x_ref[t], wih, preferred_element_type=jnp.float32)
                     + bias)
        return carry

    lax.fori_loop(0, tc, proj, 0, unroll=unroll)

    # --- Phase 2: serial recurrence, one fused (B,Hp)@(Hp,3Hp) matmul / step --
    def step(t, h):
        gh = jnp.dot(h, whh, preferred_element_type=jnp.float32)
        gi = gi_ref[t]
        r = _sigmoid(gi[:, 0 * hp:1 * hp] + gh[:, 0 * hp:1 * hp])
        z = _sigmoid(gi[:, 1 * hp:2 * hp] + gh[:, 1 * hp:2 * hp])
        n = jnp.tanh(gi[:, 2 * hp:3 * hp] + r * (gh[:, 2 * hp:3 * hp] + bhhn))
        return n + z * (h - n)

    h_ref[...] = lax.fori_loop(0, tc, step, h_ref[...], unroll=unroll)

    # --- Final FC fused into the last grid step (lane-dense padded output) ---
    @pl.when(c == pl.num_programs(1) - 1)
    def _():
        out_ref[...] = (jnp.dot(h_ref[...], wfc_ref[...],
                                preferred_element_type=jnp.float32)
                        + bfc_ref[...])


def gru_model_forward(x_btf, params, *, time_chunk=None,
                      vmem_limit_bytes=64 * 1024 * 1024,
                      stream_budget_bytes=24 * 1024 * 1024):
    """x_btf: (B, T, in_size) float32. Returns (B, out_size) float32."""
    w_ih, b_ih, w_hh, b_hh, w_fc, b_fc = params
    x_btf = x_btf.astype(jnp.float32)
    B, T, F = x_btf.shape
    H = w_hh.shape[0]
    O = w_fc.shape[1]
    Hp = _round_up(H, 128)      # lane-aligned hidden width (per-gate block size)
    Op = _round_up(O, 128)      # lane-dense output width

    # Batch-block parallel axis (uses the 2nd TensorCore on v7x for big batches).
    nb = 2 if (B % 16 == 0) else 1
    Bb = B // nb

    # VMEM-budgeted time chunk (largest divisor of T whose streamed x chunk +
    # gi scratch fit the budget); amortizes per-grid-step pipeline overhead.
    if time_chunk is None:
        time_chunk = 1
        for cand in range(1, T + 1):
            if T % cand:
                continue
            stream = 2 * cand * Bb * F * 4          # double-buffered x chunk
            scratch = cand * Bb * 3 * Hp * 4        # gi scratch
            if stream + scratch <= stream_budget_bytes:
                time_chunk = cand
    assert T % time_chunk == 0
    n_chunks = T // time_chunk

    # --- lane-aligned / zero-padded parameter layouts -------------------------
    f32 = jnp.float32

    def pad_gate_cols(w):
        # (rows, 3H) -> (rows, 3Hp) with gate g placed at columns [g*Hp, g*Hp+H)
        rows = w.shape[0]
        out = jnp.zeros((rows, 3 * Hp), f32)
        for g in range(3):
            out = out.at[:, g * Hp:g * Hp + H].set(
                w[:, g * H:(g + 1) * H].astype(f32))
        return out

    wih_p = pad_gate_cols(w_ih)                                        # (F, 3Hp)
    whh_p = jnp.zeros((Hp, 3 * Hp), f32).at[:H, :].set(pad_gate_cols(w_hh))

    # Combined additive bias: r/z gates get b_ih + b_hh, n gate gets b_ih only.
    bias_p = jnp.zeros((1, 3 * Hp), f32)
    bias_p = bias_p.at[0, 0 * Hp:0 * Hp + H].set(b_ih[0:H] + b_hh[0:H])
    bias_p = bias_p.at[0, 1 * Hp:1 * Hp + H].set(b_ih[H:2 * H] + b_hh[H:2 * H])
    bias_p = bias_p.at[0, 2 * Hp:2 * Hp + H].set(b_ih[2 * H:3 * H])
    bhhn_p = jnp.zeros((1, Hp), f32).at[0, :H].set(b_hh[2 * H:3 * H])

    wfc_p = jnp.zeros((Hp, Op), f32).at[:H, :O].set(w_fc.astype(f32))
    bfc_p = jnp.zeros((1, Op), f32).at[0, :O].set(b_fc.astype(f32))

    # Time-major x so the time axis is the leading (chunked) block dim.
    x_tbf = jnp.transpose(x_btf, (1, 0, 2))                            # (T, B, F)

    cost = pl.CostEstimate(
        flops=2 * T * B * F * 3 * Hp + 2 * T * B * Hp * 3 * Hp + 2 * B * Hp * Op,
        transcendentals=3 * T * B * Hp,
        bytes_accessed=4 * (T * B * F + F * 3 * Hp + 3 * Hp + Hp * 3 * Hp + Hp
                            + Hp * Op + Op + B * Op),
    )

    grid_spec = pltpu.PrefetchScalarGridSpec(
        num_scalar_prefetch=0,
        grid=(nb, n_chunks),
        in_specs=[
            pl.BlockSpec((time_chunk, Bb, F), lambda b, c: (c, b, 0)),   # x
            pl.BlockSpec((F, 3 * Hp), lambda b, c: (0, 0)),              # W_ih
            pl.BlockSpec((1, 3 * Hp), lambda b, c: (0, 0)),              # bias
            pl.BlockSpec((Hp, 3 * Hp), lambda b, c: (0, 0)),             # W_hh
            pl.BlockSpec((1, Hp), lambda b, c: (0, 0)),                  # b_hh(n)
            pl.BlockSpec((Hp, Op), lambda b, c: (0, 0)),                 # W_fc
            pl.BlockSpec((1, Op), lambda b, c: (0, 0)),                  # b_fc
        ],
        out_specs=pl.BlockSpec((Bb, Op), lambda b, c: (b, 0)),
        scratch_shapes=[
            pltpu.VMEM((Bb, Hp), jnp.float32),                 # recurrent state h
            pltpu.VMEM((time_chunk, Bb, 3 * Hp), jnp.float32), # chunk gi buffer
        ],
    )

    out_padded = pl.pallas_call(
        gru_kernel,
        out_shape=jax.ShapeDtypeStruct((B, Op), jnp.float32),
        grid_spec=grid_spec,
        compiler_params=pltpu.CompilerParams(
            dimension_semantics=("parallel", "arbitrary"),
            vmem_limit_bytes=vmem_limit_bytes),
        cost_estimate=cost,
    )(x_tbf, wih_p, bias_p, whh_p, bhhn_p, wfc_p, bfc_p)

    return out_padded[:, :O]


def init_params(key, in_size, hid_size, out_size):
    """Deterministic init mirroring GRUCell.adjust_params + nn.Linear default.
    Linear weights are stored pre-transposed: Linear(x) = x @ W + b."""
    std = 1.0 / math.sqrt(hid_size)
    ks = jax.random.split(key, 6)
    w_ih = jax.random.uniform(ks[0], (in_size, 3 * hid_size), jnp.float32, -std, std)
    b_ih = jax.random.uniform(ks[1], (3 * hid_size,), jnp.float32, -std, std)
    w_hh = jax.random.uniform(ks[2], (hid_size, 3 * hid_size), jnp.float32, -std, std)
    b_hh = jax.random.uniform(ks[3], (3 * hid_size,), jnp.float32, -std, std)
    w_fc = jax.random.uniform(ks[4], (hid_size, out_size), jnp.float32, -std, std)
    b_fc = jax.random.uniform(ks[5], (out_size,), jnp.float32, -std, std)
    return (w_ih, b_ih, w_hh, b_hh, w_fc, b_fc)


def reference_forward(x_btf, params):
    """Pure-JAX (f32) mirror of GRUModel.forward."""
    w_ih, b_ih, w_hh, b_hh, w_fc, b_fc = params
    B, T, _ = x_btf.shape
    H = w_hh.shape[0]
    prec = jax.lax.Precision.HIGHEST
    h = jnp.zeros((B, H), jnp.float32)
    for t in range(T):
        gi = jnp.dot(x_btf[:, t, :], w_ih, precision=prec) + b_ih
        gh = jnp.dot(h, w_hh, precision=prec) + b_hh
        r = _sigmoid(gi[:, :H] + gh[:, :H])
        z = _sigmoid(gi[:, H:2 * H] + gh[:, H:2 * H])
        n = jnp.tanh(gi[:, 2 * H:] + r * gh[:, 2 * H:])
        h = n + z * (h - n)
    return jnp.dot(h, w_fc, precision=prec) + b_fc


if __name__ == "__main__":
    B, T, IN, HID, OUT = 2, 8, 16, 32, 8
    key = jax.random.PRNGKey(0)
    kx, kp = jax.random.split(key)
    x = jax.random.normal(kx, (B, T, IN), jnp.float32)
    params = init_params(kp, IN, HID, OUT)

    out = jax.block_until_ready(gru_model_forward(x, params))
    ref = jax.block_until_ready(reference_forward(x, params))

    assert out.shape == (B, OUT)
    max_diff = float(jnp.max(jnp.abs(out - ref)))
    assert jnp.allclose(out, ref, atol=2e-3, rtol=2e-3), (
        f"mismatch vs reference: max abs diff = {max_diff}")

    print("KERNEL_OK")
</pallas_src>

<mosaic_0001>
module attributes {stable_mosaic.version = 11 : i64} {
  func.func @gru_kernel(%arg0: i32, %arg1: i32, %arg2: memref<8x2x16xf32, #tpu.memory_space<vmem>>, %arg3: memref<16x384xf32, #tpu.memory_space<vmem>>, %arg4: memref<1x384xf32, #tpu.memory_space<vmem>>, %arg5: memref<128x384xf32, #tpu.memory_space<vmem>>, %arg6: memref<1x128xf32, #tpu.memory_space<vmem>>, %arg7: memref<128x128xf32, #tpu.memory_space<vmem>>, %arg8: memref<1x128xf32, #tpu.memory_space<vmem>>, %arg9: memref<2x128xf32, #tpu.memory_space<vmem>>, %arg10: memref<2x128xf32, #tpu.memory_space<vmem>>, %arg11: memref<8x2x384xf32, #tpu.memory_space<vmem>>) attributes {dimension_semantics = [#tpu.dimension_semantics<parallel>, #tpu.dimension_semantics<arbitrary>], iteration_bounds = array<i64: 1, 1>, scalar_prefetch = 0 : i64, scratch_operands = 2 : i64, tpu.core_type = #tpu.core_type<tc>, window_params = [{transform_indices = @transform_0, window_bounds = array<i64: 8, 2, 16>}, {pipeline_mode = #tpu.pipeline_mode<synchronous>, transform_indices = @transform_1, window_bounds = array<i64: 16, 384>}, {pipeline_mode = #tpu.pipeline_mode<synchronous>, transform_indices = @transform_2, window_bounds = array<i64: 1, 384>}, {pipeline_mode = #tpu.pipeline_mode<synchronous>, transform_indices = @transform_3, window_bounds = array<i64: 128, 384>}, {pipeline_mode = #tpu.pipeline_mode<synchronous>, transform_indices = @transform_4, window_bounds = array<i64: 1, 128>}, {pipeline_mode = #tpu.pipeline_mode<synchronous>, transform_indices = @transform_5, window_bounds = array<i64: 128, 128>}, {pipeline_mode = #tpu.pipeline_mode<synchronous>, transform_indices = @transform_6, window_bounds = array<i64: 1, 128>}, {transform_indices = @transform_7, window_bounds = array<i64: 2, 128>}]} {
    %c0_i32 = arith.constant 0 : i32
    %0 = arith.cmpi eq, %arg1, %c0_i32 : i32
    %1 = arith.extui %0 : i1 to i32
    %c0_i32_0 = arith.constant 0 : i32
    %2 = arith.cmpi ne, %1, %c0_i32_0 : i32
    scf.if %2 {
      %cst_135 = arith.constant 0.000000e+00 : f32
      %352 = vector.broadcast %cst_135 : f32 to vector<2x128xf32>
      %c0_136 = arith.constant 0 : index
      %c0_137 = arith.constant 0 : index
      %353 = vector.load %arg10[%c0_136, %c0_137] : memref<2x128xf32, #tpu.memory_space<vmem>>, vector<2x128xf32>
      tpu.vector_store %arg10[%c0_136, %c0_137], %352 {strides = array<i32>} : memref<2x128xf32, #tpu.memory_space<vmem>>, vector<2x128xf32>,
    } else {
    }
    %c0 = arith.constant 0 : index
    %c0_1 = arith.constant 0 : index
    %3 = vector.load %arg3[%c0, %c0_1] : memref<16x384xf32, #tpu.memory_space<vmem>>, vector<16x384xf32>
    %c0_2 = arith.constant 0 : index
    %c0_3 = arith.constant 0 : index
    %4 = vector.load %arg5[%c0_2, %c0_3] : memref<128x384xf32, #tpu.memory_space<vmem>>, vector<128x384xf32>
    %c0_4 = arith.constant 0 : index
    %c0_5 = arith.constant 0 : index
    %5 = vector.load %arg4[%c0_4, %c0_5] : memref<1x384xf32, #tpu.memory_space<vmem>>, vector<1x384xf32>
    %6 = vector.shape_cast %5 : vector<1x384xf32> to vector<1x384xf32>
    %7 = vector.broadcast %6 : vector<1x384xf32> to vector<2x384xf32>
    %c0_6 = arith.constant 0 : index
    %c0_7 = arith.constant 0 : index
    %8 = vector.load %arg6[%c0_6, %c0_7] : memref<1x128xf32, #tpu.memory_space<vmem>>, vector<1x128xf32>
    %9 = vector.shape_cast %8 : vector<1x128xf32> to vector<1x128xf32>
    %10 = vector.broadcast %9 : vector<1x128xf32> to vector<2x128xf32>
    %c0_i32_8 = arith.constant 0 : i32
    %11 = arith.index_cast %c0_i32_8 : i32 to index
    %c0_9 = arith.constant 0 : index
    %c0_10 = arith.constant 0 : index
    %12 = vector.load %arg2[%11, %c0_9, %c0_10] : memref<8x2x16xf32, #tpu.memory_space<vmem>>, vector<1x2x16xf32>
    %13 = vector.shape_cast %12 : vector<1x2x16xf32> to vector<2x16xf32>
    %cst = arith.constant dense<0.000000e+00> : vector<2x384xf32>
    %14 = tpu.matmul %13, %3, %cst {dimension_numbers = #tpu.dot_dimension_numbers<[1], [0], [0], [1], [0, 0, 1, 1], [], []>} : vector<2x16xf32>, vector<16x384xf32>, vector<2x384xf32> -> vector<2x384xf32>
    %15 = arith.addf %14, %7 : vector<2x384xf32>
    %16 = arith.index_cast %c0_i32_8 : i32 to index
    %c0_11 = arith.constant 0 : index
    %c0_12 = arith.constant 0 : index
    %17 = vector.load %arg11[%16, %c0_11, %c0_12] : memref<8x2x384xf32, #tpu.memory_space<vmem>>, vector<1x2x384xf32>
    %18 = vector.shape_cast %17 : vector<1x2x384xf32> to vector<2x384xf32>
    %19 = vector.shape_cast %15 : vector<2x384xf32> to vector<1x2x384xf32>
    tpu.vector_store %arg11[%16, %c0_11, %c0_12], %19 {strides = array<i32>} : memref<8x2x384xf32, #tpu.memory_space<vmem>>, vector<1x2x384xf32>,
    %c1_i32 = arith.constant 1 : i32
    %20 = arith.index_cast %c1_i32 : i32 to index
    %c0_13 = arith.constant 0 : index
    %c0_14 = arith.constant 0 : index
    %21 = vector.load %arg2[%20, %c0_13, %c0_14] : memref<8x2x16xf32, #tpu.memory_space<vmem>>, vector<1x2x16xf32>
    %22 = vector.shape_cast %21 : vector<1x2x16xf32> to vector<2x16xf32>
    %cst_15 = arith.constant dense<0.000000e+00> : vector<2x384xf32>
    %23 = tpu.matmul %22, %3, %cst_15 {dimension_numbers = #tpu.dot_dimension_numbers<[1], [0], [0], [1], [0, 0, 1, 1], [], []>} : vector<2x16xf32>, vector<16x384xf32>, vector<2x384xf32> -> vector<2x384xf32>
    %24 = arith.addf %23, %7 : vector<2x384xf32>
    %25 = arith.index_cast %c1_i32 : i32 to index
    %c0_16 = arith.constant 0 : index
    %c0_17 = arith.constant 0 : index
    %26 = vector.load %arg11[%25, %c0_16, %c0_17] : memref<8x2x384xf32, #tpu.memory_space<vmem>>, vector<1x2x384xf32>
    %27 = vector.shape_cast %26 : vector<1x2x384xf32> to vector<2x384xf32>
    %28 = vector.shape_cast %24 : vector<2x384xf32> to vector<1x2x384xf32>
    tpu.vector_store %arg11[%25, %c0_16, %c0_17], %28 {strides = array<i32>} : memref<8x2x384xf32, #tpu.memory_space<vmem>>, vector<1x2x384xf32>,
    %c2_i32 = arith.constant 2 : i32
    %29 = arith.index_cast %c2_i32 : i32 to index
    %c0_18 = arith.constant 0 : index
    %c0_19 = arith.constant 0 : index
    %30 = vector.load %arg2[%29, %c0_18, %c0_19] : memref<8x2x16xf32, #tpu.memory_space<vmem>>, vector<1x2x16xf32>
    %31 = vector.shape_cast %30 : vector<1x2x16xf32> to vector<2x16xf32>
    %cst_20 = arith.constant dense<0.000000e+00> : vector<2x384xf32>
    %32 = tpu.matmul %31, %3, %cst_20 {dimension_numbers = #tpu.dot_dimension_numbers<[1], [0], [0], [1], [0, 0, 1, 1], [], []>} : vector<2x16xf32>, vector<16x384xf32>, vector<2x384xf32> -> vector<2x384xf32>
    %33 = arith.addf %32, %7 : vector<2x384xf32>
    %34 = arith.index_cast %c2_i32 : i32 to index
    %c0_21 = arith.constant 0 : index
    %c0_22 = arith.constant 0 : index
    %35 = vector.load %arg11[%34, %c0_21, %c0_22] : memref<8x2x384xf32, #tpu.memory_space<vmem>>, vector<1x2x384xf32>
    %36 = vector.shape_cast %35 : vector<1x2x384xf32> to vector<2x384xf32>
    %37 = vector.shape_cast %33 : vector<2x384xf32> to vector<1x2x384xf32>
    tpu.vector_store %arg11[%34, %c0_21, %c0_22], %37 {strides = array<i32>} : memref<8x2x384xf32, #tpu.memory_space<vmem>>, vector<1x2x384xf32>,
    %c3_i32 = arith.constant 3 : i32
    %38 = arith.index_cast %c3_i32 : i32 to index
    %c0_23 = arith.constant 0 : index
    %c0_24 = arith.constant 0 : index
    %39 = vector.load %arg2[%38, %c0_23, %c0_24] : memref<8x2x16xf32, #tpu.memory_space<vmem>>, vector<1x2x16xf32>
    %40 = vector.shape_cast %39 : vector<1x2x16xf32> to vector<2x16xf32>
    %cst_25 = arith.constant dense<0.000000e+00> : vector<2x384xf32>
    %41 = tpu.matmul %40, %3, %cst_25 {dimension_numbers = #tpu.dot_dimension_numbers<[1], [0], [0], [1], [0, 0, 1, 1], [], []>} : vector<2x16xf32>, vector<16x384xf32>, vector<2x384xf32> -> vector<2x384xf32>
    %42 = arith.addf %41, %7 : vector<2x384xf32>
    %43 = arith.index_cast %c3_i32 : i32 to index
    %c0_26 = arith.constant 0 : index
    %c0_27 = arith.constant 0 : index
    %44 = vector.load %arg11[%43, %c0_26, %c0_27] : memref<8x2x384xf32, #tpu.memory_space<vmem>>, vector<1x2x384xf32>
    %45 = vector.shape_cast %44 : vector<1x2x384xf32> to vector<2x384xf32>
    %46 = vector.shape_cast %42 : vector<2x384xf32> to vector<1x2x384xf32>
    tpu.vector_store %arg11[%43, %c0_26, %c0_27], %46 {strides = array<i32>} : memref<8x2x384xf32, #tpu.memory_space<vmem>>, vector<1x2x384xf32>,
    %c4_i32 = arith.constant 4 : i32
    %47 = arith.index_cast %c4_i32 : i32 to index
    %c0_28 = arith.constant 0 : index
    %c0_29 = arith.constant 0 : index
    %48 = vector.load %arg2[%47, %c0_28, %c0_29] : memref<8x2x16xf32, #tpu.memory_space<vmem>>, vector<1x2x16xf32>
    %49 = vector.shape_cast %48 : vector<1x2x16xf32> to vector<2x16xf32>
    %cst_30 = arith.constant dense<0.000000e+00> : vector<2x384xf32>
    %50 = tpu.matmul %49, %3, %cst_30 {dimension_numbers = #tpu.dot_dimension_numbers<[1], [0], [0], [1], [0, 0, 1, 1], [], []>} : vector<2x16xf32>, vector<16x384xf32>, vector<2x384xf32> -> vector<2x384xf32>
    %51 = arith.addf %50, %7 : vector<2x384xf32>
    %52 = arith.index_cast %c4_i32 : i32 to index
    %c0_31 = arith.constant 0 : index
    %c0_32 = arith.constant 0 : index
    %53 = vector.load %arg11[%52, %c0_31, %c0_32] : memref<8x2x384xf32, #tpu.memory_space<vmem>>, vector<1x2x384xf32>
    %54 = vector.shape_cast %53 : vector<1x2x384xf32> to vector<2x384xf32>
    %55 = vector.shape_cast %51 : vector<2x384xf32> to vector<1x2x384xf32>
    tpu.vector_store %arg11[%52, %c0_31, %c0_32], %55 {strides = array<i32>} : memref<8x2x384xf32, #tpu.memory_space<vmem>>, vector<1x2x384xf32>,
    %c5_i32 = arith.constant 5 : i32
    %56 = arith.index_cast %c5_i32 : i32 to index
    %c0_33 = arith.constant 0 : index
    %c0_34 = arith.constant 0 : index
    %57 = vector.load %arg2[%56, %c0_33, %c0_34] : memref<8x2x16xf32, #tpu.memory_space<vmem>>, vector<1x2x16xf32>
    %58 = vector.shape_cast %57 : vector<1x2x16xf32> to vector<2x16xf32>
    %cst_35 = arith.constant dense<0.000000e+00> : vector<2x384xf32>
    %59 = tpu.matmul %58, %3, %cst_35 {dimension_numbers = #tpu.dot_dimension_numbers<[1], [0], [0], [1], [0, 0, 1, 1], [], []>} : vector<2x16xf32>, vector<16x384xf32>, vector<2x384xf32> -> vector<2x384xf32>
    %60 = arith.addf %59, %7 : vector<2x384xf32>
    %61 = arith.index_cast %c5_i32 : i32 to index
    %c0_36 = arith.constant 0 : index
    %c0_37 = arith.constant 0 : index
    %62 = vector.load %arg11[%61, %c0_36, %c0_37] : memref<8x2x384xf32, #tpu.memory_space<vmem>>, vector<1x2x384xf32>
    %63 = vector.shape_cast %62 : vector<1x2x384xf32> to vector<2x384xf32>
    %64 = vector.shape_cast %60 : vector<2x384xf32> to vector<1x2x384xf32>
    tpu.vector_store %arg11[%61, %c0_36, %c0_37], %64 {strides = array<i32>} : memref<8x2x384xf32, #tpu.memory_space<vmem>>, vector<1x2x384xf32>,
    %c6_i32 = arith.constant 6 : i32
    %65 = arith.index_cast %c6_i32 : i32 to index
    %c0_38 = arith.constant 0 : index
    %c0_39 = arith.constant 0 : index
    %66 = vector.load %arg2[%65, %c0_38, %c0_39] : memref<8x2x16xf32, #tpu.memory_space<vmem>>, vector<1x2x16xf32>
    %67 = vector.shape_cast %66 : vector<1x2x16xf32> to vector<2x16xf32>
    %cst_40 = arith.constant dense<0.000000e+00> : vector<2x384xf32>
    %68 = tpu.matmul %67, %3, %cst_40 {dimension_numbers = #tpu.dot_dimension_numbers<[1], [0], [0], [1], [0, 0, 1, 1], [], []>} : vector<2x16xf32>, vector<16x384xf32>, vector<2x384xf32> -> vector<2x384xf32>
    %69 = arith.addf %68, %7 : vector<2x384xf32>
    %70 = arith.index_cast %c6_i32 : i32 to index
    %c0_41 = arith.constant 0 : index
    %c0_42 = arith.constant 0 : index
    %71 = vector.load %arg11[%70, %c0_41, %c0_42] : memref<8x2x384xf32, #tpu.memory_space<vmem>>, vector<1x2x384xf32>
    %72 = vector.shape_cast %71 : vector<1x2x384xf32> to vector<2x384xf32>
    %73 = vector.shape_cast %69 : vector<2x384xf32> to vector<1x2x384xf32>
    tpu.vector_store %arg11[%70, %c0_41, %c0_42], %73 {strides = array<i32>} : memref<8x2x384xf32, #tpu.memory_space<vmem>>, vector<1x2x384xf32>,
    %c7_i32 = arith.constant 7 : i32
    %74 = arith.index_cast %c7_i32 : i32 to index
    %c0_43 = arith.constant 0 : index
    %c0_44 = arith.constant 0 : index
    %75 = vector.load %arg2[%74, %c0_43, %c0_44] : memref<8x2x16xf32, #tpu.memory_space<vmem>>, vector<1x2x16xf32>
    %76 = vector.shape_cast %75 : vector<1x2x16xf32> to vector<2x16xf32>
    %cst_45 = arith.constant dense<0.000000e+00> : vector<2x384xf32>
    %77 = tpu.matmul %76, %3, %cst_45 {dimension_numbers = #tpu.dot_dimension_numbers<[1], [0], [0], [1], [0, 0, 1, 1], [], []>} : vector<2x16xf32>, vector<16x384xf32>, vector<2x384xf32> -> vector<2x384xf32>
    %78 = arith.addf %77, %7 : vector<2x384xf32>
    %79 = arith.index_cast %c7_i32 : i32 to index
    %c0_46 = arith.constant 0 : index
    %c0_47 = arith.constant 0 : index
    %80 = vector.load %arg11[%79, %c0_46, %c0_47] : memref<8x2x384xf32, #tpu.memory_space<vmem>>, vector<1x2x384xf32>
    %81 = vector.shape_cast %80 : vector<1x2x384xf32> to vector<2x384xf32>
    %82 = vector.shape_cast %78 : vector<2x384xf32> to vector<1x2x384xf32>
    tpu.vector_store %arg11[%79, %c0_46, %c0_47], %82 {strides = array<i32>} : memref<8x2x384xf32, #tpu.memory_space<vmem>>, vector<1x2x384xf32>,
    %c8_i32 = arith.constant 8 : i32
    %c0_48 = arith.constant 0 : index
    %c0_49 = arith.constant 0 : index
    %83 = vector.load %arg10[%c0_48, %c0_49] : memref<2x128xf32, #tpu.memory_space<vmem>>, vector<2x128xf32>
    %c0_i32_50 = arith.constant 0 : i32
    %cst_51 = arith.constant dense<0.000000e+00> : vector<2x384xf32>
    %84 = tpu.matmul %83, %4, %cst_51 {dimension_numbers = #tpu.dot_dimension_numbers<[1], [0], [0], [1], [0, 0, 1, 1], [], []>} : vector<2x128xf32>, vector<128x384xf32>, vector<2x384xf32> -> vector<2x384xf32>
    %85 = arith.index_cast %c0_i32_50 : i32 to index
    %c0_52 = arith.constant 0 : index
    %c0_53 = arith.constant 0 : index
    %86 = vector.load %arg11[%85, %c0_52, %c0_53] : memref<8x2x384xf32, #tpu.memory_space<vmem>>, vector<1x2x384xf32>
    %87 = vector.shape_cast %86 : vector<1x2x384xf32> to vector<2x384xf32>
    %88 = vector.extract_strided_slice %87 {offsets = [0, 0], sizes = [2, 128], strides = [1, 1]} : vector<2x384xf32> to vector<2x128xf32>
    %89 = vector.extract_strided_slice %84 {offsets = [0, 0], sizes = [2, 128], strides = [1, 1]} : vector<2x384xf32> to vector<2x128xf32>
    %90 = arith.addf %88, %89 : vector<2x128xf32>
    %cst_54 = arith.constant 0.000000e+00 : f32
    %91 = vector.broadcast %cst_54 : f32 to vector<2x128xf32>
    %92 = arith.subf %91, %90 : vector<2x128xf32>
    %93 = math.exp %92 : vector<2x128xf32>
    %cst_55 = arith.constant 1.000000e+00 : f32
    %94 = vector.broadcast %cst_55 : f32 to vector<2x128xf32>
    %95 = arith.addf %94, %93 : vector<2x128xf32>
    %cst_56 = arith.constant 1.000000e+00 : f32
    %96 = vector.broadcast %cst_56 : f32 to vector<2x128xf32>
    %97 = arith.divf %96, %95 : vector<2x128xf32>
    %98 = vector.extract_strided_slice %87 {offsets = [0, 128], sizes = [2, 128], strides = [1, 1]} : vector<2x384xf32> to vector<2x128xf32>
    %99 = vector.extract_strided_slice %84 {offsets = [0, 128], sizes = [2, 128], strides = [1, 1]} : vector<2x384xf32> to vector<2x128xf32>
    %100 = arith.addf %98, %99 : vector<2x128xf32>
    %cst_57 = arith.constant 0.000000e+00 : f32
    %101 = vector.broadcast %cst_57 : f32 to vector<2x128xf32>
    %102 = arith.subf %101, %100 : vector<2x128xf32>
    %103 = math.exp %102 : vector<2x128xf32>
    %cst_58 = arith.constant 1.000000e+00 : f32
    %104 = vector.broadcast %cst_58 : f32 to vector<2x128xf32>
    %105 = arith.addf %104, %103 : vector<2x128xf32>
    %cst_59 = arith.constant 1.000000e+00 : f32
    %106 = vector.broadcast %cst_59 : f32 to vector<2x128xf32>
    %107 = arith.divf %106, %105 : vector<2x128xf32>
    %108 = vector.extract_strided_slice %87 {offsets = [0, 256], sizes = [2, 128], strides = [1, 1]} : vector<2x384xf32> to vector<2x128xf32>
    %109 = vector.extract_strided_slice %84 {offsets = [0, 256], sizes = [2, 128], strides = [1, 1]} : vector<2x384xf32> to vector<2x128xf32>
    %110 = arith.addf %109, %10 : vector<2x128xf32>
    %111 = arith.mulf %97, %110 : vector<2x128xf32>
    %112 = arith.addf %108, %111 : vector<2x128xf32>
    %113 = math.tanh %112 : vector<2x128xf32>
    %114 = arith.subf %83, %113 : vector<2x128xf32>
    %115 = arith.mulf %107, %114 : vector<2x128xf32>
    %116 = arith.addf %113, %115 : vector<2x128xf32>
    %c1_i32_60 = arith.constant 1 : i32
    %cst_61 = arith.constant dense<0.000000e+00> : vector<2x384xf32>
    %117 = tpu.matmul %116, %4, %cst_61 {dimension_numbers = #tpu.dot_dimension_numbers<[1], [0], [0], [1], [0, 0, 1, 1], [], []>} : vector<2x128xf32>, vector<128x384xf32>, vector<2x384xf32> -> vector<2x384xf32>
    %118 = arith.index_cast %c1_i32_60 : i32 to index
    %c0_62 = arith.constant 0 : index
    %c0_63 = arith.constant 0 : index
    %119 = vector.load %arg11[%118, %c0_62, %c0_63] : memref<8x2x384xf32, #tpu.memory_space<vmem>>, vector<1x2x384xf32>
    %120 = vector.shape_cast %119 : vector<1x2x384xf32> to vector<2x384xf32>
    %121 = vector.extract_strided_slice %120 {offsets = [0, 0], sizes = [2, 128], strides = [1, 1]} : vector<2x384xf32> to vector<2x128xf32>
    %122 = vector.extract_strided_slice %117 {offsets = [0, 0], sizes = [2, 128], strides = [1, 1]} : vector<2x384xf32> to vector<2x128xf32>
    %123 = arith.addf %121, %122 : vector<2x128xf32>
    %cst_64 = arith.constant 0.000000e+00 : f32
    %124 = vector.broadcast %cst_64 : f32 to vector<2x128xf32>
    %125 = arith.subf %124, %123 : vector<2x128xf32>
    %126 = math.exp %125 : vector<2x128xf32>
    %cst_65 = arith.constant 1.000000e+00 : f32
    %127 = vector.broadcast %cst_65 : f32 to vector<2x128xf32>
    %128 = arith.addf %127, %126 : vector<2x128xf32>
    %cst_66 = arith.constant 1.000000e+00 : f32
    %129 = vector.broadcast %cst_66 : f32 to vector<2x128xf32>
    %130 = arith.divf %129, %128 : vector<2x128xf32>
    %131 = vector.extract_strided_slice %120 {offsets = [0, 128], sizes = [2, 128], strides = [1, 1]} : vector<2x384xf32> to vector<2x128xf32>
    %132 = vector.extract_strided_slice %117 {offsets = [0, 128], sizes = [2, 128], strides = [1, 1]} : vector<2x384xf32> to vector<2x128xf32>
    %133 = arith.addf %131, %132 : vector<2x128xf32>
    %cst_67 = arith.constant 0.000000e+00 : f32
    %134 = vector.broadcast %cst_67 : f32 to vector<2x128xf32>
    %135 = arith.subf %134, %133 : vector<2x128xf32>
    %136 = math.exp %135 : vector<2x128xf32>
    %cst_68 = arith.constant 1.000000e+00 : f32
    %137 = vector.broadcast %cst_68 : f32 to vector<2x128xf32>
    %138 = arith.addf %137, %136 : vector<2x128xf32>
    %cst_69 = arith.constant 1.000000e+00 : f32
    %139 = vector.broadcast %cst_69 : f32 to vector<2x128xf32>
    %140 = arith.divf %139, %138 : vector<2x128xf32>
    %141 = vector.extract_strided_slice %120 {offsets = [0, 256], sizes = [2, 128], strides = [1, 1]} : vector<2x384xf32> to vector<2x128xf32>
    %142 = vector.extract_strided_slice %117 {offsets = [0, 256], sizes = [2, 128], strides = [1, 1]} : vector<2x384xf32> to vector<2x128xf32>
    %143 = arith.addf %142, %10 : vector<2x128xf32>
    %144 = arith.mulf %130, %143 : vector<2x128xf32>
    %145 = arith.addf %141, %144 : vector<2x128xf32>
    %146 = math.tanh %145 : vector<2x128xf32>
    %147 = arith.subf %116, %146 : vector<2x128xf32>
    %148 = arith.mulf %140, %147 : vector<2x128xf32>
    %149 = arith.addf %146, %148 : vector<2x128xf32>
    %c2_i32_70 = arith.constant 2 : i32
    %cst_71 = arith.constant dense<0.000000e+00> : vector<2x384xf32>
    %150 = tpu.matmul %149, %4, %cst_71 {dimension_numbers = #tpu.dot_dimension_numbers<[1], [0], [0], [1], [0, 0, 1, 1], [], []>} : vector<2x128xf32>, vector<128x384xf32>, vector<2x384xf32> -> vector<2x384xf32>
    %151 = arith.index_cast %c2_i32_70 : i32 to index
    %c0_72 = arith.constant 0 : index
    %c0_73 = arith.constant 0 : index
    %152 = vector.load %arg11[%151, %c0_72, %c0_73] : memref<8x2x384xf32, #tpu.memory_space<vmem>>, vector<1x2x384xf32>
    %153 = vector.shape_cast %152 : vector<1x2x384xf32> to vector<2x384xf32>
    %154 = vector.extract_strided_slice %153 {offsets = [0, 0], sizes = [2, 128], strides = [1, 1]} : vector<2x384xf32> to vector<2x128xf32>
    %155 = vector.extract_strided_slice %150 {offsets = [0, 0], sizes = [2, 128], strides = [1, 1]} : vector<2x384xf32> to vector<2x128xf32>
    %156 = arith.addf %154, %155 : vector<2x128xf32>
    %cst_74 = arith.constant 0.000000e+00 : f32
    %157 = vector.broadcast %cst_74 : f32 to vector<2x128xf32>
    %158 = arith.subf %157, %156 : vector<2x128xf32>
    %159 = math.exp %158 : vector<2x128xf32>
    %cst_75 = arith.constant 1.000000e+00 : f32
    %160 = vector.broadcast %cst_75 : f32 to vector<2x128xf32>
    %161 = arith.addf %160, %159 : vector<2x128xf32>
    %cst_76 = arith.constant 1.000000e+00 : f32
    %162 = vector.broadcast %cst_76 : f32 to vector<2x128xf32>
    %163 = arith.divf %162, %161 : vector<2x128xf32>
    %164 = vector.extract_strided_slice %153 {offsets = [0, 128], sizes = [2, 128], strides = [1, 1]} : vector<2x384xf32> to vector<2x128xf32>
    %165 = vector.extract_strided_slice %150 {offsets = [0, 128], sizes = [2, 128], strides = [1, 1]} : vector<2x384xf32> to vector<2x128xf32>
    %166 = arith.addf %164, %165 : vector<2x128xf32>
    %cst_77 = arith.constant 0.000000e+00 : f32
    %167 = vector.broadcast %cst_77 : f32 to vector<2x128xf32>
    %168 = arith.subf %167, %166 : vector<2x128xf32>
    %169 = math.exp %168 : vector<2x128xf32>
    %cst_78 = arith.constant 1.000000e+00 : f32
    %170 = vector.broadcast %cst_78 : f32 to vector<2x128xf32>
    %171 = arith.addf %170, %169 : vector<2x128xf32>
    %cst_79 = arith.constant 1.000000e+00 : f32
    %172 = vector.broadcast %cst_79 : f32 to vector<2x128xf32>
    %173 = arith.divf %172, %171 : vector<2x128xf32>
    %174 = vector.extract_strided_slice %153 {offsets = [0, 256], sizes = [2, 128], strides = [1, 1]} : vector<2x384xf32> to vector<2x128xf32>
    %175 = vector.extract_strided_slice %150 {offsets = [0, 256], sizes = [2, 128], strides = [1, 1]} : vector<2x384xf32> to vector<2x128xf32>
    %176 = arith.addf %175, %10 : vector<2x128xf32>
    %177 = arith.mulf %163, %176 : vector<2x128xf32>
    %178 = arith.addf %174, %177 : vector<2x128xf32>
    %179 = math.tanh %178 : vector<2x128xf32>
    %180 = arith.subf %149, %179 : vector<2x128xf32>
    %181 = arith.mulf %173, %180 : vector<2x128xf32>
    %182 = arith.addf %179, %181 : vector<2x128xf32>
    %c3_i32_80 = arith.constant 3 : i32
    %cst_81 = arith.constant dense<0.000000e+00> : vector<2x384xf32>
    %183 = tpu.matmul %182, %4, %cst_81 {dimension_numbers = #tpu.dot_dimension_numbers<[1], [0], [0], [1], [0, 0, 1, 1], [], []>} : vector<2x128xf32>, vector<128x384xf32>, vector<2x384xf32> -> vector<2x384xf32>
    %184 = arith.index_cast %c3_i32_80 : i32 to index
    %c0_82 = arith.constant 0 : index
    %c0_83 = arith.constant 0 : index
    %185 = vector.load %arg11[%184, %c0_82, %c0_83] : memref<8x2x384xf32, #tpu.memory_space<vmem>>, vector<1x2x384xf32>
    %186 = vector.shape_cast %185 : vector<1x2x384xf32> to vector<2x384xf32>
    %187 = vector.extract_strided_slice %186 {offsets = [0, 0], sizes = [2, 128], strides = [1, 1]} : vector<2x384xf32> to vector<2x128xf32>
    %188 = vector.extract_strided_slice %183 {offsets = [0, 0], sizes = [2, 128], strides = [1, 1]} : vector<2x384xf32> to vector<2x128xf32>
    %189 = arith.addf %187, %188 : vector<2x128xf32>
    %cst_84 = arith.constant 0.000000e+00 : f32
    %190 = vector.broadcast %cst_84 : f32 to vector<2x128xf32>
    %191 = arith.subf %190, %189 : vector<2x128xf32>
    %192 = math.exp %191 : vector<2x128xf32>
    %cst_85 = arith.constant 1.000000e+00 : f32
    %193 = vector.broadcast %cst_85 : f32 to vector<2x128xf32>
    %194 = arith.addf %193, %192 : vector<2x128xf32>
    %cst_86 = arith.constant 1.000000e+00 : f32
    %195 = vector.broadcast %cst_86 : f32 to vector<2x128xf32>
    %196 = arith.divf %195, %194 : vector<2x128xf32>
    %197 = vector.extract_strided_slice %186 {offsets = [0, 128], sizes = [2, 128], strides = [1, 1]} : vector<2x384xf32> to vector<2x128xf32>
    %198 = vector.extract_strided_slice %183 {offsets = [0, 128], sizes = [2, 128], strides = [1, 1]} : vector<2x384xf32> to vector<2x128xf32>
    %199 = arith.addf %197, %198 : vector<2x128xf32>
    %cst_87 = arith.constant 0.000000e+00 : f32
    %200 = vector.broadcast %cst_87 : f32 to vector<2x128xf32>
    %201 = arith.subf %200, %199 : vector<2x128xf32>
    %202 = math.exp %201 : vector<2x128xf32>
    %cst_88 = arith.constant 1.000000e+00 : f32
    %203 = vector.broadcast %cst_88 : f32 to vector<2x128xf32>
    %204 = arith.addf %203, %202 : vector<2x128xf32>
    %cst_89 = arith.constant 1.000000e+00 : f32
    %205 = vector.broadcast %cst_89 : f32 to vector<2x128xf32>
    %206 = arith.divf %205, %204 : vector<2x128xf32>
    %207 = vector.extract_strided_slice %186 {offsets = [0, 256], sizes = [2, 128], strides = [1, 1]} : vector<2x384xf32> to vector<2x128xf32>
    %208 = vector.extract_strided_slice %183 {offsets = [0, 256], sizes = [2, 128], strides = [1, 1]} : vector<2x384xf32> to vector<2x128xf32>
    %209 = arith.addf %208, %10 : vector<2x128xf32>
    %210 = arith.mulf %196, %209 : vector<2x128xf32>
    %211 = arith.addf %207, %210 : vector<2x128xf32>
    %212 = math.tanh %211 : vector<2x128xf32>
    %213 = arith.subf %182, %212 : vector<2x128xf32>
    %214 = arith.mulf %206, %213 : vector<2x128xf32>
    %215 = arith.addf %212, %214 : vector<2x128xf32>
    %c4_i32_90 = arith.constant 4 : i32
    %cst_91 = arith.constant dense<0.000000e+00> : vector<2x384xf32>
    %216 = tpu.matmul %215, %4, %cst_91 {dimension_numbers = #tpu.dot_dimension_numbers<[1], [0], [0], [1], [0, 0, 1, 1], [], []>} : vector<2x128xf32>, vector<128x384xf32>, vector<2x384xf32> -> vector<2x384xf32>
    %217 = arith.index_cast %c4_i32_90 : i32 to index
    %c0_92 = arith.constant 0 : index
    %c0_93 = arith.constant 0 : index
    %218 = vector.load %arg11[%217, %c0_92, %c0_93] : memref<8x2x384xf32, #tpu.memory_space<vmem>>, vector<1x2x384xf32>
    %219 = vector.shape_cast %218 : vector<1x2x384xf32> to vector<2x384xf32>
    %220 = vector.extract_strided_slice %219 {offsets = [0, 0], sizes = [2, 128], strides = [1, 1]} : vector<2x384xf32> to vector<2x128xf32>
    %221 = vector.extract_strided_slice %216 {offsets = [0, 0], sizes = [2, 128], strides = [1, 1]} : vector<2x384xf32> to vector<2x128xf32>
    %222 = arith.addf %220, %221 : vector<2x128xf32>
    %cst_94 = arith.constant 0.000000e+00 : f32
    %223 = vector.broadcast %cst_94 : f32 to vector<2x128xf32>
    %224 = arith.subf %223, %222 : vector<2x128xf32>
    %225 = math.exp %224 : vector<2x128xf32>
    %cst_95 = arith.constant 1.000000e+00 : f32
    %226 = vector.broadcast %cst_95 : f32 to vector<2x128xf32>
    %227 = arith.addf %226, %225 : vector<2x128xf32>
    %cst_96 = arith.constant 1.000000e+00 : f32
    %228 = vector.broadcast %cst_96 : f32 to vector<2x128xf32>
    %229 = arith.divf %228, %227 : vector<2x128xf32>
    %230 = vector.extract_strided_slice %219 {offsets = [0, 128], sizes = [2, 128], strides = [1, 1]} : vector<2x384xf32> to vector<2x128xf32>
    %231 = vector.extract_strided_slice %216 {offsets = [0, 128], sizes = [2, 128], strides = [1, 1]} : vector<2x384xf32> to vector<2x128xf32>
    %232 = arith.addf %230, %231 : vector<2x128xf32>
    %cst_97 = arith.constant 0.000000e+00 : f32
    %233 = vector.broadcast %cst_97 : f32 to vector<2x128xf32>
    %234 = arith.subf %233, %232 : vector<2x128xf32>
    %235 = math.exp %234 : vector<2x128xf32>
    %cst_98 = arith.constant 1.000000e+00 : f32
    %236 = vector.broadcast %cst_98 : f32 to vector<2x128xf32>
    %237 = arith.addf %236, %235 : vector<2x128xf32>
    %cst_99 = arith.constant 1.000000e+00 : f32
    %238 = vector.broadcast %cst_99 : f32 to vector<2x128xf32>
    %239 = arith.divf %238, %237 : vector<2x128xf32>
    %240 = vector.extract_strided_slice %219 {offsets = [0, 256], sizes = [2, 128], strides = [1, 1]} : vector<2x384xf32> to vector<2x128xf32>
    %241 = vector.extract_strided_slice %216 {offsets = [0, 256], sizes = [2, 128], strides = [1, 1]} : vector<2x384xf32> to vector<2x128xf32>
    %242 = arith.addf %241, %10 : vector<2x128xf32>
    %243 = arith.mulf %229, %242 : vector<2x128xf32>
    %244 = arith.addf %240, %243 : vector<2x128xf32>
    %245 = math.tanh %244 : vector<2x128xf32>
    %246 = arith.subf %215, %245 : vector<2x128xf32>
    %247 = arith.mulf %239, %246 : vector<2x128xf32>
    %248 = arith.addf %245, %247 : vector<2x128xf32>
    %c5_i32_100 = arith.constant 5 : i32
    %cst_101 = arith.constant dense<0.000000e+00> : vector<2x384xf32>
    %249 = tpu.matmul %248, %4, %cst_101 {dimension_numbers = #tpu.dot_dimension_numbers<[1], [0], [0], [1], [0, 0, 1, 1], [], []>} : vector<2x128xf32>, vector<128x384xf32>, vector<2x384xf32> -> vector<2x384xf32>
    %250 = arith.index_cast %c5_i32_100 : i32 to index
    %c0_102 = arith.constant 0 : index
    %c0_103 = arith.constant 0 : index
    %251 = vector.load %arg11[%250, %c0_102, %c0_103] : memref<8x2x384xf32, #tpu.memory_space<vmem>>, vector<1x2x384xf32>
    %252 = vector.shape_cast %251 : vector<1x2x384xf32> to vector<2x384xf32>
    %253 = vector.extract_strided_slice %252 {offsets = [0, 0], sizes = [2, 128], strides = [1, 1]} : vector<2x384xf32> to vector<2x128xf32>
    %254 = vector.extract_strided_slice %249 {offsets = [0, 0], sizes = [2, 128], strides = [1, 1]} : vector<2x384xf32> to vector<2x128xf32>
    %255 = arith.addf %253, %254 : vector<2x128xf32>
    %cst_104 = arith.constant 0.000000e+00 : f32
    %256 = vector.broadcast %cst_104 : f32 to vector<2x128xf32>
    %257 = arith.subf %256, %255 : vector<2x128xf32>
    %258 = math.exp %257 : vector<2x128xf32>
    %cst_105 = arith.constant 1.000000e+00 : f32
    %259 = vector.broadcast %cst_105 : f32 to vector<2x128xf32>
    %260 = arith.addf %259, %258 : vector<2x128xf32>
    %cst_106 = arith.constant 1.000000e+00 : f32
    %261 = vector.broadcast %cst_106 : f32 to vector<2x128xf32>
    %262 = arith.divf %261, %260 : vector<2x128xf32>
    %263 = vector.extract_strided_slice %252 {offsets = [0, 128], sizes = [2, 128], strides = [1, 1]} : vector<2x384xf32> to vector<2x128xf32>
    %264 = vector.extract_strided_slice %249 {offsets = [0, 128], sizes = [2, 128], strides = [1, 1]} : vector<2x384xf32> to vector<2x128xf32>
    %265 = arith.addf %263, %264 : vector<2x128xf32>
    %cst_107 = arith.constant 0.000000e+00 : f32
    %266 = vector.broadcast %cst_107 : f32 to vector<2x128xf32>
    %267 = arith.subf %266, %265 : vector<2x128xf32>
    %268 = math.exp %267 : vector<2x128xf32>
    %cst_108 = arith.constant 1.000000e+00 : f32
    %269 = vector.broadcast %cst_108 : f32 to vector<2x128xf32>
    %270 = arith.addf %269, %268 : vector<2x128xf32>
    %cst_109 = arith.constant 1.000000e+00 : f32
    %271 = vector.broadcast %cst_109 : f32 to vector<2x128xf32>
    %272 = arith.divf %271, %270 : vector<2x128xf32>
    %273 = vector.extract_strided_slice %252 {offsets = [0, 256], sizes = [2, 128], strides = [1, 1]} : vector<2x384xf32> to vector<2x128xf32>
    %274 = vector.extract_strided_slice %249 {offsets = [0, 256], sizes = [2, 128], strides = [1, 1]} : vector<2x384xf32> to vector<2x128xf32>
    %275 = arith.addf %274, %10 : vector<2x128xf32>
    %276 = arith.mulf %262, %275 : vector<2x128xf32>
    %277 = arith.addf %273, %276 : vector<2x128xf32>
    %278 = math.tanh %277 : vector<2x128xf32>
    %279 = arith.subf %248, %278 : vector<2x128xf32>
    %280 = arith.mulf %272, %279 : vector<2x128xf32>
    %281 = arith.addf %278, %280 : vector<2x128xf32>
    %c6_i32_110 = arith.constant 6 : i32
    %cst_111 = arith.constant dense<0.000000e+00> : vector<2x384xf32>
    %282 = tpu.matmul %281, %4, %cst_111 {dimension_numbers = #tpu.dot_dimension_numbers<[1], [0], [0], [1], [0, 0, 1, 1], [], []>} : vector<2x128xf32>, vector<128x384xf32>, vector<2x384xf32> -> vector<2x384xf32>
    %283 = arith.index_cast %c6_i32_110 : i32 to index
    %c0_112 = arith.constant 0 : index
    %c0_113 = arith.constant 0 : index
    %284 = vector.load %arg11[%283, %c0_112, %c0_113] : memref<8x2x384xf32, #tpu.memory_space<vmem>>, vector<1x2x384xf32>
    %285 = vector.shape_cast %284 : vector<1x2x384xf32> to vector<2x384xf32>
    %286 = vector.extract_strided_slice %285 {offsets = [0, 0], sizes = [2, 128], strides = [1, 1]} : vector<2x384xf32> to vector<2x128xf32>
    %287 = vector.extract_strided_slice %282 {offsets = [0, 0], sizes = [2, 128], strides = [1, 1]} : vector<2x384xf32> to vector<2x128xf32>
    %288 = arith.addf %286, %287 : vector<2x128xf32>
    %cst_114 = arith.constant 0.000000e+00 : f32
    %289 = vector.broadcast %cst_114 : f32 to vector<2x128xf32>
    %290 = arith.subf %289, %288 : vector<2x128xf32>
    %291 = math.exp %290 : vector<2x128xf32>
    %cst_115 = arith.constant 1.000000e+00 : f32
    %292 = vector.broadcast %cst_115 : f32 to vector<2x128xf32>
    %293 = arith.addf %292, %291 : vector<2x128xf32>
    %cst_116 = arith.constant 1.000000e+00 : f32
    %294 = vector.broadcast %cst_116 : f32 to vector<2x128xf32>
    %295 = arith.divf %294, %293 : vector<2x128xf32>
    %296 = vector.extract_strided_slice %285 {offsets = [0, 128], sizes = [2, 128], strides = [1, 1]} : vector<2x384xf32> to vector<2x128xf32>
    %297 = vector.extract_strided_slice %282 {offsets = [0, 128], sizes = [2, 128], strides = [1, 1]} : vector<2x384xf32> to vector<2x128xf32>
    %298 = arith.addf %296, %297 : vector<2x128xf32>
    %cst_117 = arith.constant 0.000000e+00 : f32
    %299 = vector.broadcast %cst_117 : f32 to vector<2x128xf32>
    %300 = arith.subf %299, %298 : vector<2x128xf32>
    %301 = math.exp %300 : vector<2x128xf32>
    %cst_118 = arith.constant 1.000000e+00 : f32
    %302 = vector.broadcast %cst_118 : f32 to vector<2x128xf32>
    %303 = arith.addf %302, %301 : vector<2x128xf32>
    %cst_119 = arith.constant 1.000000e+00 : f32
    %304 = vector.broadcast %cst_119 : f32 to vector<2x128xf32>
    %305 = arith.divf %304, %303 : vector<2x128xf32>
    %306 = vector.extract_strided_slice %285 {offsets = [0, 256], sizes = [2, 128], strides = [1, 1]} : vector<2x384xf32> to vector<2x128xf32>
    %307 = vector.extract_strided_slice %282 {offsets = [0, 256], sizes = [2, 128], strides = [1, 1]} : vector<2x384xf32> to vector<2x128xf32>
    %308 = arith.addf %307, %10 : vector<2x128xf32>
    %309 = arith.mulf %295, %308 : vector<2x128xf32>
    %310 = arith.addf %306, %309 : vector<2x128xf32>
    %311 = math.tanh %310 : vector<2x128xf32>
    %312 = arith.subf %281, %311 : vector<2x128xf32>
    %313 = arith.mulf %305, %312 : vector<2x128xf32>
    %314 = arith.addf %311, %313 : vector<2x128xf32>
    %c7_i32_120 = arith.constant 7 : i32
    %cst_121 = arith.constant dense<0.000000e+00> : vector<2x384xf32>
    %315 = tpu.matmul %314, %4, %cst_121 {dimension_numbers = #tpu.dot_dimension_numbers<[1], [0], [0], [1], [0, 0, 1, 1], [], []>} : vector<2x128xf32>, vector<128x384xf32>, vector<2x384xf32> -> vector<2x384xf32>
    %316 = arith.index_cast %c7_i32_120 : i32 to index
    %c0_122 = arith.constant 0 : index
    %c0_123 = arith.constant 0 : index
    %317 = vector.load %arg11[%316, %c0_122, %c0_123] : memref<8x2x384xf32, #tpu.memory_space<vmem>>, vector<1x2x384xf32>
    %318 = vector.shape_cast %317 : vector<1x2x384xf32> to vector<2x384xf32>
    %319 = vector.extract_strided_slice %318 {offsets = [0, 0], sizes = [2, 128], strides = [1, 1]} : vector<2x384xf32> to vector<2x128xf32>
    %320 = vector.extract_strided_slice %315 {offsets = [0, 0], sizes = [2, 128], strides = [1, 1]} : vector<2x384xf32> to vector<2x128xf32>
    %321 = arith.addf %319, %320 : vector<2x128xf32>
    %cst_124 = arith.constant 0.000000e+00 : f32
    %322 = vector.broadcast %cst_124 : f32 to vector<2x128xf32>
    %323 = arith.subf %322, %321 : vector<2x128xf32>
    %324 = math.exp %323 : vector<2x128xf32>
    %cst_125 = arith.constant 1.000000e+00 : f32
    %325 = vector.broadcast %cst_125 : f32 to vector<2x128xf32>
    %326 = arith.addf %325, %324 : vector<2x128xf32>
    %cst_126 = arith.constant 1.000000e+00 : f32
    %327 = vector.broadcast %cst_126 : f32 to vector<2x128xf32>
    %328 = arith.divf %327, %326 : vector<2x128xf32>
    %329 = vector.extract_strided_slice %318 {offsets = [0, 128], sizes = [2, 128], strides = [1, 1]} : vector<2x384xf32> to vector<2x128xf32>
    %330 = vector.extract_strided_slice %315 {offsets = [0, 128], sizes = [2, 128], strides = [1, 1]} : vector<2x384xf32> to vector<2x128xf32>
    %331 = arith.addf %329, %330 : vector<2x128xf32>
    %cst_127 = arith.constant 0.000000e+00 : f32
    %332 = vector.broadcast %cst_127 : f32 to vector<2x128xf32>
    %333 = arith.subf %332, %331 : vector<2x128xf32>
    %334 = math.exp %333 : vector<2x128xf32>
    %cst_128 = arith.constant 1.000000e+00 : f32
    %335 = vector.broadcast %cst_128 : f32 to vector<2x128xf32>
    %336 = arith.addf %335, %334 : vector<2x128xf32>
    %cst_129 = arith.constant 1.000000e+00 : f32
    %337 = vector.broadcast %cst_129 : f32 to vector<2x128xf32>
    %338 = arith.divf %337, %336 : vector<2x128xf32>
    %339 = vector.extract_strided_slice %318 {offsets = [0, 256], sizes = [2, 128], strides = [1, 1]} : vector<2x384xf32> to vector<2x128xf32>
    %340 = vector.extract_strided_slice %315 {offsets = [0, 256], sizes = [2, 128], strides = [1, 1]} : vector<2x384xf32> to vector<2x128xf32>
    %341 = arith.addf %340, %10 : vector<2x128xf32>
    %342 = arith.mulf %328, %341 : vector<2x128xf32>
    %343 = arith.addf %339, %342 : vector<2x128xf32>
    %344 = math.tanh %343 : vector<2x128xf32>
    %345 = arith.subf %314, %344 : vector<2x128xf32>
    %346 = arith.mulf %338, %345 : vector<2x128xf32>
    %347 = arith.addf %344, %346 : vector<2x128xf32>
    %c8_i32_130 = arith.constant 8 : i32
    %c0_131 = arith.constant 0 : index
    %c0_132 = arith.constant 0 : index
    %348 = vector.load %arg10[%c0_131, %c0_132] : memref<2x128xf32, #tpu.memory_space<vmem>>, vector<2x128xf32>
    tpu.vector_store %arg10[%c0_131, %c0_132], %347 {strides = array<i32>} : memref<2x128xf32, #tpu.memory_space<vmem>>, vector<2x128xf32>,
    %c0_i32_133 = arith.constant 0 : i32
    %349 = arith.cmpi eq, %arg1, %c0_i32_133 : i32
    %350 = arith.extui %349 : i1 to i32
    %c0_i32_134 = arith.constant 0 : i32
    %351 = arith.cmpi ne, %350, %c0_i32_134 : i32
    scf.if %351 {
      %c0_135 = arith.constant 0 : index
      %c0_136 = arith.constant 0 : index
      %352 = vector.load %arg10[%c0_135, %c0_136] : memref<2x128xf32, #tpu.memory_space<vmem>>, vector<2x128xf32>
      %c0_137 = arith.constant 0 : index
      %c0_138 = arith.constant 0 : index
      %353 = vector.load %arg7[%c0_137, %c0_138] : memref<128x128xf32, #tpu.memory_space<vmem>>, vector<128x128xf32>
      %cst_139 = arith.constant dense<0.000000e+00> : vector<2x128xf32>
      %354 = tpu.matmul %352, %353, %cst_139 {dimension_numbers = #tpu.dot_dimension_numbers<[1], [0], [0], [1], [0, 0, 1, 1], [], []>} : vector<2x128xf32>, vector<128x128xf32>, vector<2x128xf32> -> vector<2x128xf32>
      %c0_140 = arith.constant 0 : index
      %c0_141 = arith.constant 0 : index
      %355 = vector.load %arg8[%c0_140, %c0_141] : memref<1x128xf32, #tpu.memory_space<vmem>>, vector<1x128xf32>
      %356 = vector.broadcast %355 : vector<1x128xf32> to vector<2x128xf32>
      %357 = arith.addf %354, %356 : vector<2x128xf32>
      %c0_142 = arith.constant 0 : index
      %c0_143 = arith.constant 0 : index
      %358 = vector.load %arg9[%c0_142, %c0_143] : memref<2x128xf32, #tpu.memory_space<vmem>>, vector<2x128xf32>
      tpu.vector_store %arg9[%c0_142, %c0_143], %357 {strides = array<i32>} : memref<2x128xf32, #tpu.memory_space<vmem>>, vector<2x128xf32>,
    } else {
    }
    return
  }
  func.func @transform_0(%arg0: i32, %arg1: i32) -> (i32, i32, i32) {
    %c0_i32 = arith.constant 0 : i32
    %c0_i32_0 = arith.constant 0 : i32
    return %arg1, %arg0, %c0_i32 : i32, i32, i32
  }
  func.func @transform_1(%arg0: i32, %arg1: i32) -> (i32, i32) {
    %c0_i32 = arith.constant 0 : i32
    %c0_i32_0 = arith.constant 0 : i32
    %c0_i32_1 = arith.constant 0 : i32
    return %c0_i32, %c0_i32_0 : i32, i32
  }
  func.func @transform_2(%arg0: i32, %arg1: i32) -> (i32, i32) {
    %c0_i32 = arith.constant 0 : i32
    %c0_i32_0 = arith.constant 0 : i32
    %c0_i32_1 = arith.constant 0 : i32
    return %c0_i32, %c0_i32_0 : i32, i32
  }
  func.func @transform_3(%arg0: i32, %arg1: i32) -> (i32, i32) {
    %c0_i32 = arith.constant 0 : i32
    %c0_i32_0 = arith.constant 0 : i32
    %c0_i32_1 = arith.constant 0 : i32
    return %c0_i32, %c0_i32_0 : i32, i32
  }
  func.func @transform_4(%arg0: i32, %arg1: i32) -> (i32, i32) {
    %c0_i32 = arith.constant 0 : i32
    %c0_i32_0 = arith.constant 0 : i32
    %c0_i32_1 = arith.constant 0 : i32
    return %c0_i32, %c0_i32_0 : i32, i32
  }
  func.func @transform_5(%arg0: i32, %arg1: i32) -> (i32, i32) {
    %c0_i32 = arith.constant 0 : i32
    %c0_i32_0 = arith.constant 0 : i32
    %c0_i32_1 = arith.constant 0 : i32
    return %c0_i32, %c0_i32_0 : i32, i32
  }
  func.func @transform_6(%arg0: i32, %arg1: i32) -> (i32, i32) {
    %c0_i32 = arith.constant 0 : i32
    %c0_i32_0 = arith.constant 0 : i32
    %c0_i32_1 = arith.constant 0 : i32
    return %c0_i32, %c0_i32_0 : i32, i32
  }
  func.func @transform_7(%arg0: i32, %arg1: i32) -> (i32, i32) {
    %c0_i32 = arith.constant 0 : i32
    %c0_i32_0 = arith.constant 0 : i32
    return %arg0, %c0_i32 : i32, i32
  }
}

</mosaic_0001>

<bundles_post_ra>
// kernel: tpu_custom_call.1
= control target key start
LH: loop header
LB: loop body
LE: loop exit
PB: predicated region body
PF: predicated region fallthrough
CT: control target
= control target key end

     0   :  { %12 = vsyncpa [#allocation5], 0  ;;  %s4852_s0 = inlined_call_operand.hbm [shape: f32[8,2,16], index: 0, kind: input, shape index: {}]   ;;  %s4853_s1 = inlined_call_operand.hbm [shape: f32[16,384], index: 1, kind: input, shape index: {}]   ;;  %s4854_s2 = inlined_call_operand.vmem [shape: f32[1,384], index: 2, kind: input, shape index: {}]   ;;  %s4855_s3 = inlined_call_operand.hbm [shape: f32[128,384], index: 3, kind: input, shape index: {}]   ;;  %s4856_s4 = inlined_call_operand.vmem [shape: f32[1,128], index: 4, kind: input, shape index: {}]   ;;  %s4857_s5 = inlined_call_operand.hbm [shape: f32[128,128], index: 5, kind: input, shape index: {}]   ;;  %s4858_s6 = inlined_call_operand.vmem [shape: f32[1,128], index: 6, kind: input, shape index: {}]   ;;  %s4859_s7 = inlined_call_operand.hbm [shape: f32[2,128], index: 7, kind: output, shape index: {}]  }
   0x1   :  { %13 = vsyncpa [#allocation8], 0 }
   0x2   :  { %14 = vsyncpa [#allocation11], 0 }
   0x3   :  { %15 = vsyncpa [#allocation6], 0  ;;  %s3786_s24 = smov [#allocation7]  }
   0x4   :  { %s33_s25 = sshll.u32 %s3786_s24, 4  ;;  %s34_s25 = int_to_ptr.vmem [resolvable:$true] %s33_s25 }
   0x5   :  { %s3686_s26 = scalar_lea.vmem %s34_s25, 768  ;;  %p3691_p1 = scmp.lt.s32.totalorder %s34_s25, %s34_s25 }
   0x6   :  { %p3687_p0 = scmp.ne.s32.totalorder %s34_s25, %s3686_s26  ;;  %p3692_p2 = scmp.lt.s32.totalorder %s3686_s26, %s3686_s26 }
   0x8   :  { %p3693_p3 = por %p3692_p2, %p3691_p1 }
   0xa   :  { %p3694_p4 = pnand %p3693_p3, %p3687_p0 }
   0xc   :  { %3697 = shalt.err (!%p3694_p4)
}
   0xd   :  { %s3787_s27 = smov 384   ;;  %s3788_s28 = smov 24  }
   0xe   :  { %39 = dma.hbm_to_vmem [thread:$0]  %s4853_s1, 768, %s34_s25, [#allocation8], %s3787_s27, %s3787_s27, %s3788_s28  }
   0xf   :  { %s3789_s8 = smov [#allocation4]  }
  0x10   :  { %s21_s9 = sshll.u32 %s3789_s8, 4  ;;  %s22_s9 = int_to_ptr.vmem [resolvable:$true] %s21_s9 }
  0x11   :  { %s3706_s10 = scalar_lea.vmem %s22_s9, 256  ;;  %p3711_p6 = scmp.lt.s32.totalorder %s22_s9, %s22_s9 }
  0x12   :  { %p3707_p5 = scmp.ne.s32.totalorder %s22_s9, %s3706_s10  ;;  %p3712_p7 = scmp.lt.s32.totalorder %s3706_s10, %s3706_s10 }
  0x14   :  { %p3713_p8 = por %p3712_p7, %p3711_p6 }
  0x16   :  { %p3714_p9 = pnand %p3713_p8, %p3707_p5 }
  0x18   :  { %3717 = shalt.err (!%p3714_p9)
}
  0x19   :  { %s3790_s11 = smov 32   ;;  %s3791_s12 = smov 2  }
  0x1a   :  { %27 = dma.hbm_to_vmem [thread:$0]  %s4852_s0, 256, %s22_s9, [#allocation5], %s3790_s11, %s3790_s11, %s3791_s12  }
  0x1b   :  { %s3792_s15 = smov [#allocation9]   ;;  %s3793_s17 = smov [#allocation10]  }
  0x1c   :  { %s47_s16 = sshll.u32 %s3792_s15, 4  ;;  %s61_s1 = sshll.u32 %s3793_s17, 4  ;;  %s48_s16 = int_to_ptr.vmem [resolvable:$true] %s47_s16  ;;  %s62_s1 = int_to_ptr.vmem [resolvable:$true] %s61_s1 }
  0x1d   :  { %s3726_s18 = scalar_lea.vmem %s48_s16, 6144  ;;  %p3731_p11 = scmp.lt.s32.totalorder %s48_s16, %s48_s16 }
  0x1e   :  { %p3727_p10 = scmp.ne.s32.totalorder %s48_s16, %s3726_s18  ;;  %p3732_p12 = scmp.lt.s32.totalorder %s3726_s18, %s3726_s18 }
  0x20   :  { %p3733_p13 = por %p3732_p12, %p3731_p11 }
  0x22   :  { %p3734_p0 = pnand %p3733_p13, %p3727_p10 }
  0x24   :  { %3737 = shalt.err (!%p3734_p0)
}
  0x25   :  { %53 = dma.hbm_to_vmem [thread:$0]  %s4855_s3, 6144, %s48_s16, [#allocation8], %s3787_s27, %s3787_s27, %s3788_s28  }
  0x26   :  { %s3746_s0 = scalar_lea.vmem %s62_s1, 2048  ;;  %p3751_p2 = scmp.lt.s32.totalorder %s62_s1, %s62_s1 }
  0x27   :  { %p3747_p1 = scmp.ne.s32.totalorder %s62_s1, %s3746_s0  ;;  %p3752_p3 = scmp.lt.s32.totalorder %s3746_s0, %s3746_s0 }
  0x29   :  { %p3753_p4 = por %p3752_p3, %p3751_p2 }
  0x2b   :  { %p3754_p5 = pnand %p3753_p4, %p3747_p1 }
  0x2d   :  { %3757 = shalt.err (!%p3754_p5)
}
  0x2e   :  { %s3794_s21 = smov 128   ;;  %s3795_s22 = smov 8  }
  0x2f   :  { %67 = dma.hbm_to_vmem [thread:$0]  %s4857_s5, 2048, %s62_s1, [#allocation11], %s3794_s21, %s3794_s21, %s3795_s22  }
  0x30   :  { %3778 = dma.done.wait [#allocation5], 256  }
  0x31   :  { %3779 = vsyncadd [#allocation5], 4294967040 }
  0x32   :  { %3780 = dma.done.wait [#allocation8], 6912  }
  0x33   :  { %3781 = vsyncadd [#allocation8], 4294960384 }
  0x34   :  { %3782 = dma.done.wait [#allocation11], 2048  }
  0x35   :  { %3783 = vsyncadd [#allocation11], 4294965248  ;;  %v4860_v0 = vmov 0.0   ;;  %v3861_v1 = vld [vmem:[#allocation7 + $0x20] sm:$0xff]  ;;  %v3863_v2 = vld [vmem:[#allocation7 + $0x18] sm:$0xff]  ;;  %vm166_vm0 = vcmask 130048  }
  0x36   :  { %234 = vmatprep.mubr.f32.mxu1 %v4860_v0  ;;  %86 = vst [vmem:[#allocation2] sm:$0x3] %v4860_v0  ;;  %905 = vmatprep.mubr.f32.mxu0 %v4860_v0  ;;  %v3865_v3 = vld [vmem:[#allocation7 + $0x8] sm:$0xff]  ;;  %v3869_v4 = vld [vmem:[#allocation7] sm:$0xff]  ;;  %v165_v5 = vld [vmem:[#allocation4] sm:$0x3] }
  0x37   :  { %198 = vmatprep.subr.mxu1 %v3861_v1  ;;  %869 = vmatprep.subr.mxu0 %v3861_v1  ;;  %v3875_v6 = vld [vmem:[#allocation4 + $0x8] sm:$0x3]  ;;  %v3879_v7 = vld [vmem:[#allocation7 + $0x28] sm:$0xff]  ;;  %v3886_v8 = vld [vmem:[#allocation7 + $0x10] sm:$0xff]  ;;  %vm3797_vm1 = vmmov 0   ;;  %s3799_s29 = smov [#allocation12]  }
  0x38   :  { %199 = vmatpush1.msra.mxu1 %v3863_v2  ;;  %870 = vmatpush1.msra.mxu0 %v3863_v2  ;;  %v3895_v9 = vld [vmem:[#allocation4 + $0xa] sm:$0x3]  ;;  %v333_v10 = vld [vmem:[#allocation4 + $0x2] sm:$0x3]  ;;  %v3910_v11 = vld [vmem:[#allocation4 + $0xc] sm:$0x3] }
  0x39   :  { %200 = vmatprep.subr.mxu1 %v3865_v3  ;;  %871 = vmatprep.subr.mxu0 %v3865_v3  ;;  %v3926_v12 = vld [vmem:[#allocation4 + $0xe] sm:$0x3]  ;;  %v3928_v13 = vld [vmem:[#allocation9 + $0x170] sm:$0xff]  ;;  %v3936_v15 = vld [vmem:[#allocation9 + $0x158] sm:$0xff]  ;;  %s2958_s30 = sshll.u32 %s3799_s29, 4  ;;  %s2959_s30 = int_to_ptr.vmem [resolvable:$true] %s2958_s30 }
  0x3a   :  { %201 = vmatpush1.msra.mxu1 %v3869_v4  ;;  %872 = vmatpush1.msra.mxu0 %v3869_v4  ;;  %4890 = vst [vmem:[#allocation17_spill] sm:$0xff] %v3928_v13  ;;  %v3932_v14 = vld [vmem:[#allocation9 + $0x168] sm:$0xff]  ;;  %v3943_v16 = vld [vmem:[#allocation9 + $0x150] sm:$0xff]  ;;  %v501_v17 = vld [vmem:[#allocation4 + $0x4] sm:$0x3]  ;;  %s3758_s8 = scalar_lea.vmem %s2959_s30, 32  ;;  %p3763_p7 = scmp.lt.s32.totalorder %s2959_s30, %s2959_s30 }
  0x3b   :  { %2970 = vmatmul.mubr.msk.f32.vlgmr.msra.gmra.mxu1 %vm166_vm0, %v165_v5  ;;  %3164 = vmatprep.subr.mxu1 %v4860_v0  ;;  %v3947_v18 = vld [vmem:[#allocation9 + $0x140] sm:$0xff]  ;;  %v3951_v19 = vld [vmem:[#allocation9 + $0x138] sm:$0xff]  ;;  %v3955_v20 = vld [vmem:[#allocation9 + $0x128] sm:$0xff]  ;;  %p3759_p6 = scmp.ne.s32.totalorder %s2959_s30, %s3758_s8  ;;  %p3764_p8 = scmp.lt.s32.totalorder %s3758_s8, %s3758_s8 }
  0x3c   :  { %2978 = vmatmul.mubr.msk.f32.vlgmr.msra.gmra.mxu0 %vm166_vm0, %v3875_v6  ;;  %1037 = vmatprep.subr.mxu0 %v3861_v1  ;;  %v3961_v21 = vld [vmem:[#allocation9 + $0x120] sm:$0xff]  ;;  %v3965_v22 = vld [vmem:[#allocation9 + $0x110] sm:$0xff]  ;;  %v3970_v23 = vld [vmem:[#allocation9 + $0x108] sm:$0xff] }
  0x3d   :  { %3165 = vmatpush3.msra.mxu1 %v3879_v7  ;;  %1038 = vmatpush1.msra.mxu0 %v3863_v2  ;;  %v3974_v24 = vld [vmem:[#allocation9 + $0xf8] sm:$0xff]  ;;  %v3980_v25 = vld [vmem:[#allocation9 + $0xf0] sm:$0xff]  ;;  %v669_v26 = vld [vmem:[#allocation4 + $0x6] sm:$0x3]  ;;  %p3765_p9 = por %p3764_p8, %p3763_p7 }
  0x3e   :  { %3166 = vmatprep.subr.mxu1 %v4860_v0  ;;  %1039 = vmatprep.subr.mxu0 %v3865_v3  ;;  %v3984_v27 = vld [vmem:[#allocation9 + $0xe0] sm:$0xff]  ;;  %v3988_v28 = vld [vmem:[#allocation9 + $0xd8] sm:$0xff]  ;;  %v3992_v29 = vld [vmem:[#allocation9 + $0xc8] sm:$0xff] }
  0x3f   :  { %3167 = vmatpush3.msra.mxu1 %v3886_v8  ;;  %3168 = vmatprep.mubr.msk.f32.mxu1 %vm3797_vm1, %v4860_v0  ;;  %v3998_v30 = vld [vmem:[#allocation9 + $0xc0] sm:$0xff]  ;;  %v4002_v31 = vld [vmem:[#allocation9 + $0xb0] sm:$0xff]  ;;  %v4007_v32 = vld [vmem:[#allocation9 + $0xa8] sm:$0xff]  ;;  %p3766_p10 = pnand %p3765_p9, %p3759_p6 }
  0x40   :  { %1040 = vmatpush1.msra.mxu0 %v3869_v4  ;;  %1073 = vmatprep.mubr.f32.mxu0 %v4860_v0  ;;  %v4011_v33 = vld [vmem:[#allocation9 + $0x98] sm:$0xff]  ;;  %v4017_v34 = vld [vmem:[#allocation9 + $0x90] sm:$0xff]  ;;  %v4021_v35 = vld [vmem:[#allocation9 + $0x80] sm:$0xff] }
  0x41   :  { %3169 = vmatmul.mubr.msk.f32.vlgmr.msra.gmra.mxu1 %vm166_vm0, %v165_v5  ;;  %365 = vmatprep.subr.mxu1 %v3861_v1  ;;  %v4026_v36 = vld [vmem:[#allocation9 + $0x78] sm:$0xff]  ;;  %v4031_v37 = vld [vmem:[#allocation9 + $0x68] sm:$0xff]  ;;  %v4037_v38 = vld [vmem:[#allocation9 + $0x60] sm:$0xff] }
  0x42   :  { %2980 = vmatmul.mubr.msk.f32.vlgmr.msra.gmra.mxu0 %vm166_vm0, %v3895_v9  ;;  %1205 = vmatprep.subr.mxu0 %v3861_v1  ;;  %v4041_v39 = vld [vmem:[#allocation9 + $0x50] sm:$0xff]  ;;  %v4046_v40 = vld [vmem:[#allocation9 + $0x48] sm:$0xff]  ;;  %v4051_v41 = vld [vmem:[#allocation9 + $0x38] sm:$0xff] }
  0x43   :  { %366 = vmatpush1.msra.mxu1 %v3863_v2  ;;  %1206 = vmatpush1.msra.mxu0 %v3863_v2  ;;  %v4057_v42 = vld [vmem:[#allocation9 + $0x30] sm:$0xff]  ;;  %v4061_v43 = vld [vmem:[#allocation9 + $0x20] sm:$0xff]  ;;  %v4066_v44 = vld [vmem:[#allocation9 + $0x18] sm:$0xff] }
  0x44   :  { %367 = vmatprep.subr.mxu1 %v3865_v3  ;;  %1207 = vmatprep.subr.mxu0 %v3865_v3  ;;  %4891 = vst [vmem:[#allocation18_spill] sm:$0xff] %v4057_v42  ;;  %4892 = vst [vmem:[#allocation19_spill] sm:$0xff] %v4061_v43  ;;  %v4071_v45 = vld [vmem:[#allocation9 + $0x8] sm:$0xff]  ;;  %v4077_v46 = vld [vmem:[#allocation9] sm:$0xff] }
  0x45   :  { %368 = vmatpush1.msra.mxu1 %v3869_v4  ;;  %401 = vmatprep.mubr.f32.mxu1 %v4860_v0  ;;  %4893 = vst [vmem:[#allocation20_spill] sm:$0xff] %v4066_v44  ;;  %4894 = vst [vmem:[#allocation21_spill] sm:$0xff] %v4071_v45  ;;  %v4081_v47 = vld [vmem:[#allocation2] sm:$0x3]  ;;  %v4088_v48 = vld [vmem:[#allocation9 + $0x178] sm:$0xff] }
  0x46   :  { %1208 = vmatpush1.msra.mxu0 %v3869_v4  ;;  %1241 = vmatprep.mubr.f32.mxu0 %v4860_v0  ;;  %4895 = vst [vmem:[#allocation22_spill] sm:$0xff] %v4077_v46  ;;  %v4094_v49 = vld [vmem:[#allocation9 + $0x160] sm:$0xff]  ;;  %v4101_v50 = vld [vmem:[#allocation9 + $0x148] sm:$0xff]  ;;  %v4107_v51 = vld [vmem:[#allocation9 + $0x130] sm:$0xff] }
  0x47   :  { %2972 = vmatmul.mubr.msk.f32.vlgmr.msra.gmra.mxu1 %vm166_vm0, %v333_v10  ;;  %3171 = vmatprep.subr.mxu1 %v4860_v0  ;;  %v4113_v52 = vld [vmem:[#allocation9 + $0x118] sm:$0xff]  ;;  %v4119_v53 = vld [vmem:[#allocation9 + $0x100] sm:$0xff]  ;;  %v4125_v54 = vld [vmem:[#allocation9 + $0xe8] sm:$0xff] }
  0x48   :  { %2982 = vmatmul.mubr.msk.f32.vlgmr.msra.gmra.mxu0 %vm166_vm0, %v3910_v11  ;;  %1373 = vmatprep.subr.mxu0 %v3861_v1  ;;  %v4131_v55 = vld [vmem:[#allocation9 + $0xd0] sm:$0xff]  ;;  %v4137_v56 = vld [vmem:[#allocation9 + $0xb8] sm:$0xff]  ;;  %v4143_v57 = vld [vmem:[#allocation9 + $0xa0] sm:$0xff] }
  0x49   :  { %3172 = vmatpush3.msra.mxu1 %v3879_v7  ;;  %1374 = vmatpush1.msra.mxu0 %v3863_v2  ;;  %v4149_v58 = vld [vmem:[#allocation9 + $0x88] sm:$0xff]  ;;  %v4155_v59 = vld [vmem:[#allocation9 + $0x70] sm:$0xff]  ;;  %v4161_v60 = vld [vmem:[#allocation9 + $0x58] sm:$0xff] }
  0x4a   :  { %3173 = vmatprep.subr.mxu1 %v4860_v0  ;;  %1375 = vmatprep.subr.mxu0 %v3865_v3  ;;  %v4167_v61 = vld [vmem:[#allocation9 + $0x40] sm:$0xff]  ;;  %v4173_v62 = vld [vmem:[#allocation9 + $0x28] sm:$0xff]  ;;  %v4179_v63 = vld [vmem:[#allocation9 + $0x10] sm:$0xff] }
  0x4b   :  { %3174 = vmatpush3.msra.mxu1 %v3886_v8  ;;  %3175 = vmatprep.mubr.msk.f32.mxu1 %vm3797_vm1, %v4860_v0  ;;  %4896 = vst [vmem:[#allocation23_spill] sm:$0xff] %v4167_v61  ;;  %4897 = vst [vmem:[#allocation24_spill] sm:$0xff] %v4173_v62 }
  0x4c   :  { %1376 = vmatpush1.msra.mxu0 %v3869_v4  ;;  %1409 = vmatprep.mubr.f32.mxu0 %v4860_v0  ;;  %4898 = vst [vmem:[#allocation25_spill] sm:$0xff] %v4179_v63 }
  0x4d   :  { %3176 = vmatmul.mubr.msk.f32.vlgmr.msra.gmra.mxu1 %vm166_vm0, %v333_v10  ;;  %533 = vmatprep.subr.mxu1 %v3861_v1 }
  0x4e   :  { %2984 = vmatmul.mubr.msk.f32.vlgmr.msra.gmra.mxu0 %vm166_vm0, %v3926_v12  ;;  %1509 = vmatprep.subr.mxu0 %v3928_v13 }
  0x4f   :  { %534 = vmatpush1.msra.mxu1 %v3863_v2  ;;  %1510 = vmatpush1.msra.mxu0 %v3932_v14 }
  0x50   :  { %535 = vmatprep.subr.mxu1 %v3865_v3  ;;  %1511 = vmatprep.subr.mxu0 %v3936_v15 }
  0x51   :  { %536 = vmatpush1.msra.mxu1 %v3869_v4  ;;  %569 = vmatprep.mubr.f32.mxu1 %v4860_v0 }
  0x52   :  { %1512 = vmatpush1.msra.mxu0 %v3943_v16  ;;  %2974 = vmatmul.mubr.msk.f32.vlgmr.msra.gmra.mxu1 %vm166_vm0, %v501_v17 }
  0x53   :  { %3178 = vmatprep.subr.mxu1 %v4860_v0  ;;  %1513 = vmatprep.subr.mxu0 %v3947_v18 }
  0x54   :  { %3179 = vmatpush3.msra.mxu1 %v3879_v7  ;;  %1514 = vmatpush1.msra.mxu0 %v3951_v19 }
  0x55   :  { %3180 = vmatprep.subr.mxu1 %v4860_v0  ;;  %1515 = vmatprep.subr.mxu0 %v3955_v20 }
  0x56   :  { %3181 = vmatpush3.msra.mxu1 %v3886_v8  ;;  %3182 = vmatprep.mubr.msk.f32.mxu1 %vm3797_vm1, %v4860_v0 }
  0x57   :  { %1516 = vmatpush1.msra.mxu0 %v3961_v21  ;;  %3183 = vmatmul.mubr.msk.f32.vlgmr.msra.gmra.mxu1 %vm166_vm0, %v501_v17 }
  0x58   :  { %701 = vmatprep.subr.mxu1 %v3861_v1  ;;  %1517 = vmatprep.subr.mxu0 %v3965_v22  ;;  %v143_v1 = vlaneseq }
  0x59   :  { %702 = vmatpush1.msra.mxu1 %v3863_v2  ;;  %1518 = vmatpush1.msra.mxu0 %v3970_v23 }
  0x5a   :  { %703 = vmatprep.subr.mxu1 %v3865_v3  ;;  %1519 = vmatprep.subr.mxu0 %v3974_v24  ;;  %v144_v2 = vshrl.u32 %v143_v1, 7 }
  0x5b   :  { %704 = vmatpush1.msra.mxu1 %v3869_v4  ;;  %737 = vmatprep.mubr.f32.mxu1 %v4860_v0  ;;  %v3798_v4 = vmov 1983009808  }
  0x5c   :  { %1520 = vmatpush1.msra.mxu0 %v3980_v25  ;;  %2976 = vmatmul.mubr.msk.f32.vlgmr.msra.gmra.mxu1 %vm166_vm0, %v669_v26  ;;  %v145_v3 = vsub.s32 0, %v144_v2  ;;  %v316_v5 = vunpack.c.l.s4 %v3798_v4 }
  0x5d   :  { %3185 = vmatprep.subr.mxu1 %v4860_v0  ;;  %1521 = vmatprep.subr.mxu0 %v3984_v27 }
  0x5e   :  { %3186 = vmatpush3.msra.mxu1 %v3879_v7  ;;  %1522 = vmatpush1.msra.mxu0 %v3988_v28 }
  0x5f   :  { %3187 = vmatprep.subr.mxu1 %v4860_v0  ;;  %1523 = vmatprep.subr.mxu0 %v3992_v29 }
  0x60   :  { %3188 = vmatpush3.msra.mxu1 %v3886_v8  ;;  %3189 = vmatprep.mubr.msk.f32.mxu1 %vm3797_vm1, %v4860_v0 }
  0x61   :  { %1524 = vmatpush1.msra.mxu0 %v3998_v30  ;;  %3190 = vmatmul.mubr.msk.f32.vlgmr.msra.gmra.mxu1 %vm166_vm0, %v669_v26 }
  0x62   :  { %3192 = vmatprep.subr.mxu1 %v4860_v0  ;;  %1525 = vmatprep.subr.mxu0 %v4002_v31 }
  0x63   :  { %3193 = vmatpush3.msra.mxu1 %v3879_v7  ;;  %1526 = vmatpush1.msra.mxu0 %v4007_v32 }
  0x64   :  { %3194 = vmatprep.subr.mxu1 %v4860_v0  ;;  %1527 = vmatprep.subr.mxu0 %v4011_v33 }
  0x65   :  { %3195 = vmatpush3.msra.mxu1 %v3886_v8  ;;  %3196 = vmatprep.mubr.msk.f32.mxu1 %vm3797_vm1, %v4860_v0 }
  0x66   :  { %1528 = vmatpush1.msra.mxu0 %v4017_v34  ;;  %3197 = vmatmul.mubr.msk.f32.vlgmr.msra.gmra.mxu1 %vm166_vm0, %v3875_v6  ;;  %v149_v6 = vsub.s32 1, %v144_v2 }
  0x67   :  { %3199 = vmatprep.subr.mxu1 %v4860_v0  ;;  %1529 = vmatprep.subr.mxu0 %v4021_v35 }
  0x68   :  { %3200 = vmatpush3.msra.mxu1 %v3879_v7  ;;  %1530 = vmatpush1.msra.mxu0 %v4026_v36 }
  0x69   :  { %3201 = vmatprep.subr.mxu1 %v4860_v0  ;;  %1531 = vmatprep.subr.mxu0 %v4031_v37 }
  0x6a   :  { %3202 = vmatpush3.msra.mxu1 %v3886_v8  ;;  %3203 = vmatprep.mubr.msk.f32.mxu1 %vm3797_vm1, %v4860_v0 }
  0x6b   :  { %1532 = vmatpush1.msra.mxu0 %v4037_v38  ;;  %3204 = vmatmul.mubr.msk.f32.vlgmr.msra.gmra.mxu1 %vm166_vm0, %v3895_v9  ;;  %v317_v9 = vunpack.c.0.s8 %v316_v5 }
  0x6c   :  { %3206 = vmatprep.subr.mxu1 %v4860_v0  ;;  %1533 = vmatprep.subr.mxu0 %v4041_v39 }
  0x6d   :  { %3207 = vmatpush3.msra.mxu1 %v3879_v7  ;;  %1534 = vmatpush1.msra.mxu0 %v4046_v40 }
  0x6e   :  { %3208 = vmatprep.subr.mxu1 %v4860_v0  ;;  %1535 = vmatprep.subr.mxu0 %v4051_v41 }
  0x6f   :  { %3209 = vmatpush3.msra.mxu1 %v3886_v8  ;;  %3210 = vmatprep.mubr.msk.f32.mxu1 %vm3797_vm1, %v4860_v0 }
  0x70   :  { %1536 = vmatpush1.msra.mxu0 %v4057_v42  ;;  %3211 = vmatmul.mubr.msk.f32.vlgmr.msra.gmra.mxu1 %vm166_vm0, %v3910_v11  ;;  %v153_v11 = vsub.s32 2, %v144_v2 }
  0x71   :  { %3213 = vmatprep.subr.mxu1 %v4860_v0  ;;  %1537 = vmatprep.subr.mxu0 %v4061_v43 }
  0x72   :  { %3214 = vmatpush3.msra.mxu1 %v3879_v7  ;;  %1538 = vmatpush1.msra.mxu0 %v4066_v44  ;;  %v141_v7 = vld [vmem:[%s4854_s2] sm:$0x7] }
  0x73   :  { %3215 = vmatprep.subr.mxu1 %v4860_v0  ;;  %1539 = vmatprep.subr.mxu0 %v4071_v45  ;;  %v4232_v10 = vrot.slane %v141_v7, %v149_v6  ;;  %v4238_v4 = vrot.slane %v141_v7, %v153_v11 }
  0x74   :  { %3216 = vmatpush3.msra.mxu1 %v3886_v8  ;;  %3217 = vmatprep.mubr.msk.f32.mxu1 %vm3797_vm1, %v4860_v0  ;;  %v4230_v8 = vrot.slane %v141_v7, %v145_v3 }
  0x75   :  { %1540 = vmatpush1.msra.mxu0 %v4077_v46  ;;  %1573 = vmatprep.mubr.f32.mxu0 %v4860_v0 }
  0x76   :  { %3218 = vmatmul.mubr.msk.f32.vlgmr.msra.gmra.mxu1 %vm166_vm0, %v3926_v12  ;;  %1574 = vmatmul.mubr.f32.vlgmr.msra.gmra.mxu0 %v4081_v47 }
  0x77   :  { %3220 = vmatprep.subr.mxu1 %v4860_v0  ;;  %3252 = vmatprep.mubr.msk.f32.mxu1 %vm3797_vm1, %v4860_v0 }
  0x78   :  { %3221 = vmatpush3.msra.mxu1 %v4088_v48  ;;  %1677 = vmatprep.subr.mxu0 %v3928_v13 }
  0x79   :  { %3222 = vmatprep.subr.mxu1 %v4860_v0  ;;  %1678 = vmatpush1.msra.mxu0 %v3932_v14 }
  0x7a   :  { %3223 = vmatpush3.msra.mxu1 %v4094_v49  ;;  %1679 = vmatprep.subr.mxu0 %v3936_v15 }
  0x7b   :  { %3224 = vmatprep.subr.mxu1 %v4860_v0  ;;  %1680 = vmatpush1.msra.mxu0 %v3943_v16 }
  0x7c   :  { %3225 = vmatpush3.msra.mxu1 %v4101_v50  ;;  %1681 = vmatprep.subr.mxu0 %v3947_v18 }
  0x7d   :  { %3226 = vmatprep.subr.mxu1 %v4860_v0  ;;  %1682 = vmatpush1.msra.mxu0 %v3951_v19 }
  0x7e   :  { %3227 = vmatpush3.msra.mxu1 %v4107_v51  ;;  %1683 = vmatprep.subr.mxu0 %v3955_v20 }
  0x7f   :  { %3228 = vmatprep.subr.mxu1 %v4860_v0  ;;  %1684 = vmatpush1.msra.mxu0 %v3961_v21 }
  0x80   :  { %3229 = vmatpush3.msra.mxu1 %v4113_v52  ;;  %1685 = vmatprep.subr.mxu0 %v3965_v22 }
  0x81   :  { %3230 = vmatprep.subr.mxu1 %v4860_v0  ;;  %1686 = vmatpush1.msra.mxu0 %v3970_v23 }
  0x82   :  { %3231 = vmatpush3.msra.mxu1 %v4119_v53  ;;  %1687 = vmatprep.subr.mxu0 %v3974_v24 }
  0x83   :  { %3232 = vmatprep.subr.mxu1 %v4860_v0  ;;  %1688 = vmatpush1.msra.mxu0 %v3980_v25 }
  0x84   :  { %3233 = vmatpush3.msra.mxu1 %v4125_v54  ;;  %1689 = vmatprep.subr.mxu0 %v3984_v27 }
  0x85   :  { %3234 = vmatprep.subr.mxu1 %v4860_v0  ;;  %1690 = vmatpush1.msra.mxu0 %v3988_v28 }
  0x86   :  { %3235 = vmatpush3.msra.mxu1 %v4131_v55  ;;  %1691 = vmatprep.subr.mxu0 %v3992_v29 }
  0x87   :  { %3236 = vmatprep.subr.mxu1 %v4860_v0  ;;  %1692 = vmatpush1.msra.mxu0 %v3998_v30 }
  0x88   :  { %3237 = vmatpush3.msra.mxu1 %v4137_v56  ;;  %1693 = vmatprep.subr.mxu0 %v4002_v31 }
  0x89   :  { %3238 = vmatprep.subr.mxu1 %v4860_v0  ;;  %1694 = vmatpush1.msra.mxu0 %v4007_v32 }
  0x8a   :  { %3239 = vmatpush3.msra.mxu1 %v4143_v57  ;;  %1695 = vmatprep.subr.mxu0 %v4011_v33 }
  0x8b   :  { %3240 = vmatprep.subr.mxu1 %v4860_v0  ;;  %1696 = vmatpush1.msra.mxu0 %v4017_v34 }
  0x8c   :  { %3241 = vmatpush3.msra.mxu1 %v4149_v58  ;;  %1697 = vmatprep.subr.mxu0 %v4021_v35 }
  0x8d   :  { %3242 = vmatprep.subr.mxu1 %v4860_v0  ;;  %1698 = vmatpush1.msra.mxu0 %v4026_v36 }
  0x8e   :  { %3243 = vmatpush3.msra.mxu1 %v4155_v59  ;;  %1699 = vmatprep.subr.mxu0 %v4031_v37 }
  0x8f   :  { %3244 = vmatprep.subr.mxu1 %v4860_v0  ;;  %1700 = vmatpush1.msra.mxu0 %v4037_v38 }
  0x90   :  { %3245 = vmatpush3.msra.mxu1 %v4161_v60  ;;  %1701 = vmatprep.subr.mxu0 %v4041_v39 }
  0x91   :  { %3246 = vmatprep.subr.mxu1 %v4860_v0  ;;  %1702 = vmatpush1.msra.mxu0 %v4046_v40 }
  0x92   :  { %3247 = vmatpush3.msra.mxu1 %v4167_v61  ;;  %1703 = vmatprep.subr.mxu0 %v4051_v41 }
  0x93   :  { %3248 = vmatprep.subr.mxu1 %v4860_v0  ;;  %1704 = vmatpush1.msra.mxu0 %v4057_v42 }
  0x94   :  { %3249 = vmatpush3.msra.mxu1 %v4173_v62  ;;  %1705 = vmatprep.subr.mxu0 %v4061_v43 }
  0x95   :  { %3250 = vmatprep.subr.mxu1 %v4860_v0  ;;  %1706 = vmatpush1.msra.mxu0 %v4066_v44 }
  0x96   :  { %3251 = vmatpush3.msra.mxu1 %v4179_v63  ;;  %1707 = vmatprep.subr.mxu0 %v4071_v45 }
  0x97   :  { %3253 = vmatmul.mubr.f32.vlgmr.msra.gmra.mxu1 %v4081_v47  ;;  %3255 = vmatprep.subr.mxu1 %v4860_v0 }
  0x98   :  { %3256 = vmatpush3.msra.mxu1 %v4088_v48  ;;  %1708 = vmatpush1.msra.mxu0 %v4077_v46 }
  0x99   :  { %3257 = vmatprep.subr.mxu1 %v4860_v0  ;;  %1741 = vmatprep.mubr.f32.mxu0 %v4860_v0 }
  0x9a   :  { %3258 = vmatpush3.msra.mxu1 %v4094_v49  ;;  %3287 = vmatprep.mubr.msk.f32.mxu1 %vm3797_vm1, %v4860_v0 }
  0x9b   :  { %3259 = vmatprep.subr.mxu1 %v4860_v0  ;;  %1845 = vmatprep.subr.mxu0 %v3928_v13 }
  0x9c   :  { %3260 = vmatpush3.msra.mxu1 %v4101_v50 }
  0x9d   :  { %3261 = vmatprep.subr.mxu1 %v4860_v0 }
  0x9e   :  { %3262 = vmatpush3.msra.mxu1 %v4107_v51 }
  0x9f   :  { %3263 = vmatprep.subr.mxu1 %v4860_v0 }
  0xa0   :  { %3264 = vmatpush3.msra.mxu1 %v4113_v52 }
  0xa1   :  { %3265 = vmatprep.subr.mxu1 %v4860_v0 }
  0xa2   :  { %3266 = vmatpush3.msra.mxu1 %v4119_v53 }
  0xa3   :  { %3267 = vmatprep.subr.mxu1 %v4860_v0 }
  0xa4   :  { %3268 = vmatpush3.msra.mxu1 %v4125_v54 }
  0xa5   :  { %3269 = vmatprep.subr.mxu1 %v4860_v0 }
  0xa6   :  { %3270 = vmatpush3.msra.mxu1 %v4131_v55 }
  0xa7   :  { %3271 = vmatprep.subr.mxu1 %v4860_v0 }
  0xa8   :  { %3272 = vmatpush3.msra.mxu1 %v4137_v56 }
  0xa9   :  { %3273 = vmatprep.subr.mxu1 %v4860_v0 }
  0xaa   :  { %3274 = vmatpush3.msra.mxu1 %v4143_v57 }
  0xab   :  { %3275 = vmatprep.subr.mxu1 %v4860_v0 }
  0xac   :  { %3276 = vmatpush3.msra.mxu1 %v4149_v58 }
  0xad   :  { %3277 = vmatprep.subr.mxu1 %v4860_v0 }
  0xae   :  { %3278 = vmatpush3.msra.mxu1 %v4155_v59 }
  0xaf   :  { %3279 = vmatprep.subr.mxu1 %v4860_v0 }
  0xb0   :  { %3280 = vmatpush3.msra.mxu1 %v4161_v60 }
  0xb1   :  { %3281 = vmatprep.subr.mxu1 %v4860_v0 }
  0xb2   :  { %3282 = vmatpush3.msra.mxu1 %v4167_v61 }
  0xb3   :  { %3283 = vmatprep.subr.mxu1 %v4860_v0 }
  0xb4   :  { %3284 = vmatpush3.msra.mxu1 %v4173_v62 }
  0xb5   :  { %3285 = vmatprep.subr.mxu1 %v4860_v0 }
  0xb6   :  { %3286 = vmatpush3.msra.mxu1 %v4179_v63 }
  0xb7   :  { %3290 = vmatprep.subr.mxu1 %v4860_v0  ;;  %v4235_v0 = vsub.s32 %v317_v9, %v144_v2 }
  0xfb   :  { %v236_v12 = vpop.f32.mrf.mxu1 }
  0xfc   :  { %v237_v17 = vadd.f32 %v236_v12, %v4230_v8 }
  0xfd   :  { %v238_v26 = vpop.f32.mrf.mxu1 }
  0xfe   :  { %v239_v1 = vadd.f32 %v238_v26, %v4232_v10 }
 0x100   :  { %v314_v13 = vcombine.low %v237_v17, %v239_v1  ;;  %v907_v1 = vpop.f32.mrf.mxu0 }
 0x101   :  { %v307_v63 = vpop.f32.mrf.mxu1 }
 0x102   :  { %v321_v46 = vrot.slane %v314_v13, %v4235_v0  ;;  %v308_v3 = vadd.f32 %v307_v63, %v4238_v4 }
 0x103   :  { %v3170_v5 = vpop.f32.mrf.mxu1 }
 0x104   :  { %v328_v6 = vrot.slane %v308_v3, %v4235_v0 }
 0x106   :  { %v329_v45 = vcombine.low %v321_v46, %v328_v6  ;;  %v909_v6 = vpop.f32.mrf.mxu0 }
 0x107   :  { %v403_v62 = vpop.f32.mrf.mxu1 }
 0x108   :  { %331 = vst [vmem:[#allocation3] sm:$0x3f] %v329_v45  ;;  %v404_v12 = vadd.f32 %v403_v62, %v4230_v8 }
 0x109   :  { %v405_v2 = vpop.f32.mrf.mxu1 }
 0x10a   :  { %v406_v9 = vadd.f32 %v405_v2, %v4232_v10 }
 0x10c   :  { %v481_v26 = vcombine.low %v404_v12, %v406_v9 }
 0x10d   :  { %v474_v7 = vpop.f32.mrf.mxu1 }
 0x10e   :  { %v488_v11 = vrot.slane %v481_v26, %v4235_v0  ;;  %v475_v17 = vadd.f32 %v474_v7, %v4238_v4 }
 0x10f   :  { %v3177_v13 = vpop.f32.mrf.mxu1 }
 0x110   :  { %v495_v63 = vrot.slane %v475_v17, %v4235_v0  ;;  %v1075_v13 = vpop.f32.mrf.mxu0 }
 0x112   :  { %v496_v5 = vcombine.low %v488_v11, %v495_v63  ;;  %v571_v3 = vpop.f32.mrf.mxu1 }
 0x113   :  { %v572_v46 = vadd.f32 %v571_v3, %v4230_v8  ;;  %v1077_v3 = vpop.f32.mrf.mxu0 }
 0x114   :  { %499 = vst [vmem:[#allocation3 + $0x6] sm:$0x3f] %v496_v5  ;;  %v573_v45 = vpop.f32.mrf.mxu1  ;;  %v1078_v61 = vadd.f32 %v1077_v3, %v4232_v10 }
 0x115   :  { %v574_v62 = vadd.f32 %v573_v45, %v4232_v10 }
 0x117   :  { %v649_v2 = vcombine.low %v572_v46, %v574_v62  ;;  %v642_v12 = vpop.f32.mrf.mxu1  ;;  %v908_v46 = vadd.f32 %v907_v1, %v4230_v8  ;;  %v910_v62 = vadd.f32 %v909_v6, %v4232_v10 }
 0x118   :  { %v643_v9 = vadd.f32 %v642_v12, %v4238_v4 }
 0x119   :  { %v656_v26 = vrot.slane %v649_v2, %v4235_v0  ;;  %v3184_v7 = vpop.f32.mrf.mxu1  ;;  %v1243_v2 = vpop.f32.mrf.mxu0 }
 0x11a   :  { %v663_v17 = vrot.slane %v643_v9, %v4235_v0 }
 0x11c   :  { %v664_v44 = vcombine.low %v656_v26, %v663_v17  ;;  %v739_v11 = vpop.f32.mrf.mxu1 }
 0x11d   :  { %v740_v63 = vadd.f32 %v739_v11, %v4230_v8  ;;  %v985_v11 = vcombine.low %v908_v46, %v910_v62 }
 0x11e   :  { %667 = vst [vmem:[#allocation3 + $0xc] sm:$0x3f] %v664_v44  ;;  %v741_v5 = vpop.f32.mrf.mxu1  ;;  %v1076_v44 = vadd.f32 %v1075_v13, %v4230_v8 }
 0x11f   :  { %v742_v45 = vadd.f32 %v741_v5, %v4232_v10  ;;  %v1245_v5 = vpop.f32.mrf.mxu0 }
 0x120   :  { %v1246_v46 = vadd.f32 %v1245_v5, %v4232_v10 }
 0x121   :  { %v817_v12 = vcombine.low %v740_v63, %v742_v45  ;;  %v810_v43 = vpop.f32.mrf.mxu1  ;;  %v992_v45 = vrot.slane %v985_v11, %v4235_v0 }
 0x122   :  { %v811_v7 = vadd.f32 %v810_v43, %v4238_v4 }
 0x123   :  { %v824_v9 = vrot.slane %v817_v12, %v4235_v0  ;;  %v3191_v26 = vpop.f32.mrf.mxu1  ;;  %v1153_v12 = vcombine.low %v1076_v44, %v1078_v61 }
 0x124   :  { %v831_v17 = vrot.slane %v811_v7, %v4235_v0  ;;  %v1411_v26 = vpop.f32.mrf.mxu0  ;;  %v1244_v7 = vadd.f32 %v1243_v2, %v4230_v8 }
 0x125   :  { %v1412_v61 = vadd.f32 %v1411_v26, %v4230_v8 }
 0x126   :  { %v832_v42 = vcombine.low %v824_v9, %v831_v17  ;;  %v978_v1 = vpop.f32.mrf.mxu1  ;;  %v1160_v17 = vrot.slane %v1153_v12, %v4235_v0  ;;  %v1321_v11 = vcombine.low %v1244_v7, %v1246_v46 }
 0x127   :  { %v979_v6 = vadd.f32 %v978_v1, %v4238_v4 }
 0x128   :  { %835 = vst [vmem:[#allocation3 + $0x12] sm:$0x3f] %v832_v42  ;;  %v3198_v63 = vpop.f32.mrf.mxu1  ;;  %v1413_v42 = vpop.f32.mrf.mxu0 }
 0x129   :  { %v999_v43 = vrot.slane %v979_v6, %v4235_v0  ;;  %v1414_v2 = vadd.f32 %v1413_v42, %v4232_v10 }
 0x12b   :  { %v1000_v13 = vcombine.low %v992_v45, %v999_v43  ;;  %v1146_v62 = vpop.f32.mrf.mxu1  ;;  %v1328_v45 = vrot.slane %v1321_v11, %v4235_v0 }
 0x12c   :  { %v1147_v3 = vadd.f32 %v1146_v62, %v4238_v4 }
 0x12d   :  { %1003 = vst [vmem:[#allocation3 + $0x18] sm:$0x3f] %v1000_v13  ;;  %v3205_v9 = vpop.f32.mrf.mxu1  ;;  %v1489_v13 = vcombine.low %v1412_v61, %v1414_v2 }
 0x12e   :  { %v1167_v1 = vrot.slane %v1147_v3, %v4235_v0  ;;  %v1650_v3 = vld [vmem:[#allocation3] sm:$0x3f] }
 0x12f   :  { %v1496_v10 = vrot.slane %v1489_v13, %v4235_v0 }
 0x130   :  { %v1168_v63 = vcombine.low %v1160_v17, %v1167_v1  ;;  %v1314_v6 = vpop.f32.mrf.mxu1 }
 0x131   :  { %v1315_v44 = vadd.f32 %v1314_v6, %v4238_v4 }
 0x132   :  { %1171 = vst [vmem:[#allocation3 + $0x1e] sm:$0x3f] %v1168_v63  ;;  %v3212_v5 = vpop.f32.mrf.mxu1  ;;  %v1659_v63 = vrot.slane %v1650_v3, 2 }
 0x133   :  { %v1335_v43 = vrot.slane %v1315_v44, %v4235_v0 }
 0x135   :  { %v1336_v12 = vcombine.low %v1328_v45, %v1335_v43 }
 0x136   :  { %v1482_v62 = vpop.f32.mrf.mxu1  ;;  %v1575_v9 = vpop.f32.mrf.mxu0 }
 0x137   :  { %1339 = vst [vmem:[#allocation3 + $0x24] sm:$0x3f] %v1336_v12  ;;  %v1483_v7 = vadd.f32 %v1482_v62, %v4238_v4  ;;  %v1651_v46 = vadd.f32 %v1650_v3, %v1575_v9  ;;  %v4281_v4 = vld [vmem:[%s4856_s4] ss:$0 sm:$0xff]  ;;  %v1670_v62 = vrot.slane %v1650_v3, 4  ;;  %v4899_v3 = vmov 0.0  }
 0x138   :  { %v3219_v8 = vpop.f32.mrf.mxu1  ;;  %v1577_v11 = vpop.f32.mrf.mxu0 }
 0x139   :  { %v1503_v26 = vrot.slane %v1483_v7, %v4235_v0  ;;  %v1652_v17 = vsub.f32 0.0, %v1651_v46  ;;  %v1661_v6 = vadd.f32 %v1659_v63, %v1577_v11  ;;  %v4902_v11 = vld [vmem:[#allocation19_spill] sm:$0xff]  ;;  %v4903_v63 = vld [vmem:[#allocation20_spill] sm:$0xff] }
 0x13b   :  { %v1504_v42 = vcombine.low %v1496_v10, %v1503_v26  ;;  %v1653_v1 = vmul.f32 1.442695, %v1652_v17  ;;  %v1662_v61 = vsub.f32 0.0, %v1661_v6  ;;  %v4904_v6 = vld [vmem:[#allocation24_spill] sm:$0xff] }
 0x13d   :  { %1507 = vst [vmem:[#allocation3 + $0x2a] sm:$0x3f] %v1504_v42  ;;  %3549 = vpow2.f32 %v1653_v1  ;;  %v1663_v2 = vmul.f32 1.442695, %v1662_v61  ;;  %v4901_v1 = vld [vmem:[#allocation23_spill] sm:$0xff]  ;;  %v4905_v61 = vld [vmem:[#allocation21_spill] sm:$0xff] }
 0x13f   :  { %3551 = vpow2.f32 %v1663_v2  ;;  %v4906_v2 = vld [vmem:[#allocation22_spill] sm:$0xff] }
 0x14a   :  { %v3550_v44 = vpop.eup %3549 }
 0x14b   :  { %v1655_v5 = vadd.f32 1.0, %v3550_v44  ;;  %v4907_v44 = vld [vmem:[#allocation25_spill] sm:$0xff] }
 0x14c   :  { %v3552_v43 = vpop.eup %3551 }
 0x14d   :  { %3553 = vrcp.f32 %v1655_v5  ;;  %v1665_v7 = vadd.f32 1.0, %v3552_v43  ;;  %v4908_v5 = vld [vmem:[#allocation17_spill] sm:$0xff] }
 0x157   :  { %v1646_v0 = vpop.f32.mrf.mxu1 }
 0x158   :  { %v1668_v45 = vadd.f32 %v4281_v4, %v1646_v0 }
 0x159   :  { %v3254_v13 = vpop.f32.mrf.mxu1 }
 0x15a   :  { %v3554_v12 = vpop.eup %3553 }
 0x15b   :  { %v1669_v9 = vmul.f32 %v3554_v12, %v1668_v45  ;;  %v1818_v45 = vld [vmem:[#allocation3 + $0x6] sm:$0x3f] }
 0x15d   :  { %v1672_v46 = vadd.f32 %v1670_v62, %v1669_v9 }
 0x15f   :  { %3555 = vtanh.f32 %v1672_v46  ;;  %v1827_v46 = vrot.slane %v1818_v45, 2 }
 0x160   :  { %3557 = vrcp.f32 %v1665_v7 }
 0x16c   :  { %v3556_v8 = vpop.eup %3555 }
 0x16d   :  { %v1674_v10 = vsub.f32 %v4081_v47, %v3556_v8  ;;  %v3558_v26 = vpop.eup %3557  ;;  %v4900_v47 = vld [vmem:[#allocation18_spill] sm:$0xff] }
 0x16f   :  { %v1675_v17 = vmul.f32 %v3558_v26, %v1674_v10 }
 0x171   :  { %v4285_v42 = vadd.f32 %v3556_v8, %v1675_v17 }
 0x173   :  { %1742 = vmatmul.mubr.f32.vlgmr.msra.gmra.mxu0 %v4285_v42  ;;  %3288 = vmatmul.mubr.f32.vlgmr.msra.gmra.mxu1 %v4285_v42 }
 0x174   :  { %1846 = vmatpush1.msra.mxu0 %v3932_v14  ;;  %3291 = vmatpush3.msra.mxu1 %v4088_v48 }
 0x175   :  { %1847 = vmatprep.subr.mxu0 %v3936_v15  ;;  %3292 = vmatprep.subr.mxu1 %v4899_v3 }
 0x176   :  { %1848 = vmatpush1.msra.mxu0 %v3943_v16  ;;  %3293 = vmatpush3.msra.mxu1 %v4094_v49 }
 0x177   :  { %1849 = vmatprep.subr.mxu0 %v3947_v18  ;;  %3294 = vmatprep.subr.mxu1 %v4899_v3 }
 0x178   :  { %1850 = vmatpush1.msra.mxu0 %v3951_v19  ;;  %3295 = vmatpush3.msra.mxu1 %v4101_v50 }
 0x179   :  { %1851 = vmatprep.subr.mxu0 %v3955_v20  ;;  %3296 = vmatprep.subr.mxu1 %v4899_v3 }
 0x17a   :  { %1852 = vmatpush1.msra.mxu0 %v3961_v21  ;;  %3297 = vmatpush3.msra.mxu1 %v4107_v51 }
 0x17b   :  { %1853 = vmatprep.subr.mxu0 %v3965_v22  ;;  %3298 = vmatprep.subr.mxu1 %v4899_v3 }
 0x17c   :  { %1854 = vmatpush1.msra.mxu0 %v3970_v23  ;;  %3299 = vmatpush3.msra.mxu1 %v4113_v52 }
 0x17d   :  { %1855 = vmatprep.subr.mxu0 %v3974_v24  ;;  %3300 = vmatprep.subr.mxu1 %v4899_v3 }
 0x17e   :  { %1856 = vmatpush1.msra.mxu0 %v3980_v25  ;;  %3301 = vmatpush3.msra.mxu1 %v4119_v53 }
 0x17f   :  { %1857 = vmatprep.subr.mxu0 %v3984_v27  ;;  %3302 = vmatprep.subr.mxu1 %v4899_v3 }
 0x180   :  { %1858 = vmatpush1.msra.mxu0 %v3988_v28  ;;  %3303 = vmatpush3.msra.mxu1 %v4125_v54 }
 0x181   :  { %1859 = vmatprep.subr.mxu0 %v3992_v29  ;;  %3304 = vmatprep.subr.mxu1 %v4899_v3 }
 0x182   :  { %1860 = vmatpush1.msra.mxu0 %v3998_v30  ;;  %3305 = vmatpush3.msra.mxu1 %v4131_v55 }
 0x183   :  { %1861 = vmatprep.subr.mxu0 %v4002_v31  ;;  %3306 = vmatprep.subr.mxu1 %v4899_v3 }
 0x184   :  { %1862 = vmatpush1.msra.mxu0 %v4007_v32  ;;  %3307 = vmatpush3.msra.mxu1 %v4137_v56 }
 0x185   :  { %1863 = vmatprep.subr.mxu0 %v4011_v33  ;;  %3308 = vmatprep.subr.mxu1 %v4899_v3 }
 0x186   :  { %1864 = vmatpush1.msra.mxu0 %v4017_v34  ;;  %3309 = vmatpush3.msra.mxu1 %v4143_v57 }
 0x187   :  { %1865 = vmatprep.subr.mxu0 %v4021_v35  ;;  %3310 = vmatprep.subr.mxu1 %v4899_v3 }
 0x188   :  { %1866 = vmatpush1.msra.mxu0 %v4026_v36  ;;  %3311 = vmatpush3.msra.mxu1 %v4149_v58 }
 0x189   :  { %1867 = vmatprep.subr.mxu0 %v4031_v37  ;;  %3312 = vmatprep.subr.mxu1 %v4899_v3 }
 0x18a   :  { %1868 = vmatpush1.msra.mxu0 %v4037_v38  ;;  %3313 = vmatpush3.msra.mxu1 %v4155_v59 }
 0x18b   :  { %1869 = vmatprep.subr.mxu0 %v4041_v39  ;;  %3314 = vmatprep.subr.mxu1 %v4899_v3 }
 0x18c   :  { %1870 = vmatpush1.msra.mxu0 %v4046_v40  ;;  %3315 = vmatpush3.msra.mxu1 %v4161_v60 }
 0x18d   :  { %1871 = vmatprep.subr.mxu0 %v4051_v41  ;;  %3316 = vmatprep.subr.mxu1 %v4899_v3 }
 0x18e   :  { %1872 = vmatpush1.msra.mxu0 %v4900_v47  ;;  %3317 = vmatpush3.msra.mxu1 %v4901_v1 }
 0x18f   :  { %1873 = vmatprep.subr.mxu0 %v4902_v11  ;;  %3318 = vmatprep.subr.mxu1 %v4899_v3 }
 0x190   :  { %1874 = vmatpush1.msra.mxu0 %v4903_v63  ;;  %3319 = vmatpush3.msra.mxu1 %v4904_v6  ;;  %v1838_v6 = vrot.slane %v1818_v45, 4 }
 0x191   :  { %1875 = vmatprep.subr.mxu0 %v4905_v61  ;;  %3320 = vmatprep.subr.mxu1 %v4899_v3 }
 0x192   :  { %1876 = vmatpush1.msra.mxu0 %v4906_v2  ;;  %1909 = vmatprep.mubr.f32.mxu0 %v4899_v3 }
 0x193   :  { %3321 = vmatpush3.msra.mxu1 %v4907_v44  ;;  %3322 = vmatprep.mubr.msk.f32.mxu1 %vm3797_vm1, %v4899_v3 }
 0x194   :  { %2013 = vmatprep.subr.mxu0 %v4908_v5  ;;  %3325 = vmatprep.subr.mxu1 %v4899_v3 }
 0x233   :  { %v1743_v0 = vpop.f32.mrf.mxu0  ;;  %v1814_v43 = vpop.f32.mrf.mxu1 }
 0x234   :  { %v1819_v13 = vadd.f32 %v1818_v45, %v1743_v0  ;;  %v1836_v2 = vadd.f32 %v4281_v4, %v1814_v43  ;;  %v4445_v45 = vld [vmem:[#allocation9 + $0x150] sm:$0xff]  ;;  %v4449_v43 = vld [vmem:[#allocation9 + $0x140] sm:$0xff] }
 0x235   :  { %v3289_v12 = vpop.f32.mrf.mxu1  ;;  %v1745_v7 = vpop.f32.mrf.mxu0 }
 0x236   :  { %v1820_v62 = vsub.f32 0.0, %v1819_v13  ;;  %v1829_v8 = vadd.f32 %v1827_v46, %v1745_v7 }
 0x238   :  { %v1821_v9 = vmul.f32 1.442695, %v1820_v62  ;;  %v1830_v10 = vsub.f32 0.0, %v1829_v8  ;;  %v4453_v8 = vld [vmem:[#allocation9 + $0x138] sm:$0xff] }
 0x23a   :  { %3559 = vpow2.f32 %v1821_v9  ;;  %v1831_v26 = vmul.f32 1.442695, %v1830_v10  ;;  %v4461_v10 = vld [vmem:[#allocation9 + $0x120] sm:$0xff] }
 0x23c   :  { %3561 = vpow2.f32 %v1831_v26  ;;  %v4469_v26 = vld [vmem:[#allocation9 + $0x108] sm:$0xff] }
 0x247   :  { %v3560_v17 = vpop.eup %3559 }
 0x248   :  { %v1823_v44 = vadd.f32 1.0, %v3560_v17  ;;  %v4477_v17 = vld [vmem:[#allocation9 + $0xf0] sm:$0xff] }
 0x249   :  { %v3562_v5 = vpop.eup %3561 }
 0x24a   :  { %3563 = vrcp.f32 %v1823_v44  ;;  %v1833_v12 = vadd.f32 1.0, %v3562_v5  ;;  %v4441_v44 = vld [vmem:[#allocation9 + $0x158] sm:$0xff] }
 0x24b   :  { %v4485_v5 = vld [vmem:[#allocation9 + $0xd8] sm:$0xff] }
 0x257   :  { %v3564_v61 = vpop.eup %3563 }
 0x258   :  { %v1837_v63 = vmul.f32 %v3564_v61, %v1836_v2  ;;  %v4437_v2 = vld [vmem:[#allocation9 + $0x168] sm:$0xff] }
 0x25a   :  { %v1840_v0 = vadd.f32 %v1838_v6, %v1837_v63 }
 0x25c   :  { %3565 = vtanh.f32 %v1840_v0  ;;  %v4493_v0 = vld [vmem:[#allocation9 + $0xc0] sm:$0xff] }
 0x25d   :  { %3567 = vrcp.f32 %v1833_v12  ;;  %v4501_v12 = vld [vmem:[#allocation9 + $0xa8] sm:$0xff] }
 0x269   :  { %v3566_v13 = vpop.eup %3565 }
 0x26a   :  { %v1842_v62 = vsub.f32 %v4285_v42, %v3566_v13  ;;  %v3568_v9 = vpop.eup %3567 }
 0x26c   :  { %v1843_v7 = vmul.f32 %v3568_v9, %v1842_v62  ;;  %v4517_v62 = vld [vmem:[#allocation9 + $0x78] sm:$0xff]  ;;  %v4525_v9 = vld [vmem:[#allocation9 + $0x60] sm:$0xff] }
 0x26e   :  { %v4358_v46 = vadd.f32 %v3566_v13, %v1843_v7  ;;  %v4509_v13 = vld [vmem:[#allocation9 + $0x90] sm:$0xff]  ;;  %v4533_v7 = vld [vmem:[#allocation9 + $0x48] sm:$0xff] }
 0x270   :  { %1910 = vmatmul.mubr.f32.vlgmr.msra.gmra.mxu0 %v4358_v46  ;;  %3323 = vmatmul.mubr.f32.vlgmr.msra.gmra.mxu1 %v4358_v46 }
 0x271   :  { %2014 = vmatpush1.msra.mxu0 %v3932_v14  ;;  %3326 = vmatpush3.msra.mxu1 %v4088_v48  ;;  %v4909_v14 = vld [vmem:[#allocation20_spill] sm:$0xff] }
 0x272   :  { %2015 = vmatprep.subr.mxu0 %v3936_v15  ;;  %3327 = vmatprep.subr.mxu1 %v4899_v3  ;;  %v4910_v15 = vld [vmem:[#allocation24_spill] sm:$0xff] }
 0x273   :  { %2016 = vmatpush1.msra.mxu0 %v3943_v16  ;;  %3328 = vmatpush3.msra.mxu1 %v4094_v49  ;;  %v4911_v16 = vld [vmem:[#allocation21_spill] sm:$0xff] }
 0x274   :  { %2017 = vmatprep.subr.mxu0 %v3947_v18  ;;  %3329 = vmatprep.subr.mxu1 %v4899_v3  ;;  %v4912_v18 = vld [vmem:[#allocation22_spill] sm:$0xff] }
 0x275   :  { %2018 = vmatpush1.msra.mxu0 %v3951_v19  ;;  %3330 = vmatpush3.msra.mxu1 %v4101_v50  ;;  %v4913_v19 = vld [vmem:[#allocation25_spill] sm:$0xff] }
 0x276   :  { %2019 = vmatprep.subr.mxu0 %v3955_v20  ;;  %3331 = vmatprep.subr.mxu1 %v4899_v3  ;;  %v4427_v20 = vld [vmem:[#allocation9 + $0x170] sm:$0xff] }
 0x277   :  { %2020 = vmatpush1.msra.mxu0 %v3961_v21  ;;  %3332 = vmatpush3.msra.mxu1 %v4107_v51  ;;  %4914 = vst [vmem:[#allocation18_spill] sm:$0xff] %v4427_v20 }
 0x278   :  { %2021 = vmatprep.subr.mxu0 %v3965_v22  ;;  %3333 = vmatprep.subr.mxu1 %v4899_v3  ;;  %v1986_v22 = vld [vmem:[#allocation3 + $0xc] sm:$0x3f] }
 0x279   :  { %2022 = vmatpush1.msra.mxu0 %v3970_v23  ;;  %3334 = vmatpush3.msra.mxu1 %v4113_v52 }
 0x27a   :  { %2023 = vmatprep.subr.mxu0 %v3974_v24  ;;  %3335 = vmatprep.subr.mxu1 %v4899_v3 }
 0x27b   :  { %2024 = vmatpush1.msra.mxu0 %v3980_v25  ;;  %3336 = vmatpush3.msra.mxu1 %v4119_v53 }
 0x27c   :  { %2025 = vmatprep.subr.mxu0 %v3984_v27  ;;  %3337 = vmatprep.subr.mxu1 %v4899_v3 }
 0x27d   :  { %2026 = vmatpush1.msra.mxu0 %v3988_v28  ;;  %3338 = vmatpush3.msra.mxu1 %v4125_v54 }
 0x27e   :  { %2027 = vmatprep.subr.mxu0 %v3992_v29  ;;  %3339 = vmatprep.subr.mxu1 %v4899_v3 }
 0x27f   :  { %2028 = vmatpush1.msra.mxu0 %v3998_v30  ;;  %3340 = vmatpush3.msra.mxu1 %v4131_v55  ;;  %v1995_v30 = vrot.slane %v1986_v22, 2 }
 0x280   :  { %2029 = vmatprep.subr.mxu0 %v4002_v31  ;;  %3341 = vmatprep.subr.mxu1 %v4899_v3 }
 0x281   :  { %2030 = vmatpush1.msra.mxu0 %v4007_v32  ;;  %3342 = vmatpush3.msra.mxu1 %v4137_v56 }
 0x282   :  { %2031 = vmatprep.subr.mxu0 %v4011_v33  ;;  %3343 = vmatprep.subr.mxu1 %v4899_v3 }
 0x283   :  { %2032 = vmatpush1.msra.mxu0 %v4017_v34  ;;  %3344 = vmatpush3.msra.mxu1 %v4143_v57 }
 0x284   :  { %2033 = vmatprep.subr.mxu0 %v4021_v35  ;;  %3345 = vmatprep.subr.mxu1 %v4899_v3 }
 0x285   :  { %2034 = vmatpush1.msra.mxu0 %v4026_v36  ;;  %3346 = vmatpush3.msra.mxu1 %v4149_v58 }
 0x286   :  { %2035 = vmatprep.subr.mxu0 %v4031_v37  ;;  %3347 = vmatprep.subr.mxu1 %v4899_v3 }
 0x287   :  { %2036 = vmatpush1.msra.mxu0 %v4037_v38  ;;  %3348 = vmatpush3.msra.mxu1 %v4155_v59 }
 0x288   :  { %2037 = vmatprep.subr.mxu0 %v4041_v39  ;;  %3349 = vmatprep.subr.mxu1 %v4899_v3  ;;  %v2006_v39 = vrot.slane %v1986_v22, 4 }
 0x289   :  { %2038 = vmatpush1.msra.mxu0 %v4046_v40  ;;  %3350 = vmatpush3.msra.mxu1 %v4161_v60 }
 0x28a   :  { %2039 = vmatprep.subr.mxu0 %v4051_v41  ;;  %3351 = vmatprep.subr.mxu1 %v4899_v3 }
 0x28b   :  { %2040 = vmatpush1.msra.mxu0 %v4900_v47  ;;  %3352 = vmatpush3.msra.mxu1 %v4901_v1 }
 0x28c   :  { %2041 = vmatprep.subr.mxu0 %v4902_v11  ;;  %3353 = vmatprep.subr.mxu1 %v4899_v3 }
 0x28d   :  { %2042 = vmatpush1.msra.mxu0 %v4909_v14  ;;  %3354 = vmatpush3.msra.mxu1 %v4910_v15  ;;  %v4549_v14 = vld [vmem:[#allocation9 + $0x18] sm:$0xff] }
 0x28e   :  { %2043 = vmatprep.subr.mxu0 %v4911_v16  ;;  %3355 = vmatprep.subr.mxu1 %v4899_v3  ;;  %4915 = vst [vmem:[#allocation23_spill] sm:$0xff] %v4549_v14  ;;  %v4557_v16 = vld [vmem:[#allocation9] sm:$0xff] }
 0x28f   :  { %2044 = vmatpush1.msra.mxu0 %v4912_v18  ;;  %2077 = vmatprep.mubr.f32.mxu0 %v4899_v3  ;;  %4917 = vst [vmem:[#allocation17_spill] sm:$0xff] %v4557_v16 }
 0x290   :  { %3356 = vmatpush3.msra.mxu1 %v4913_v19  ;;  %3357 = vmatprep.mubr.msk.f32.mxu1 %vm3797_vm1, %v4899_v3 }
 0x291   :  { %2181 = vmatprep.subr.mxu0 %v4427_v20  ;;  %3360 = vmatprep.subr.mxu1 %v4899_v3 }
 0x330   :  { %v1911_v21 = vpop.f32.mrf.mxu0  ;;  %v1982_v23 = vpop.f32.mrf.mxu1 }
 0x331   :  { %v1987_v24 = vadd.f32 %v1986_v22, %v1911_v21  ;;  %v2004_v37 = vadd.f32 %v4281_v4, %v1982_v23 }
 0x332   :  { %v3324_v25 = vpop.f32.mrf.mxu1  ;;  %v1913_v29 = vpop.f32.mrf.mxu0 }
 0x333   :  { %v1988_v27 = vsub.f32 0.0, %v1987_v24  ;;  %v1997_v31 = vadd.f32 %v1995_v30, %v1913_v29 }
 0x335   :  { %v1989_v28 = vmul.f32 1.442695, %v1988_v27  ;;  %v1998_v32 = vsub.f32 0.0, %v1997_v31 }
 0x337   :  { %3569 = vpow2.f32 %v1989_v28  ;;  %v1999_v33 = vmul.f32 1.442695, %v1998_v32 }
 0x339   :  { %3571 = vpow2.f32 %v1999_v33 }
 0x344   :  { %v3570_v34 = vpop.eup %3569 }
 0x345   :  { %v1991_v35 = vadd.f32 1.0, %v3570_v34 }
 0x346   :  { %v3572_v36 = vpop.eup %3571 }
 0x347   :  { %3573 = vrcp.f32 %v1991_v35  ;;  %v2001_v42 = vadd.f32 1.0, %v3572_v36 }
 0x354   :  { %v3574_v38 = vpop.eup %3573 }
 0x355   :  { %v2005_v40 = vmul.f32 %v3574_v38, %v2004_v37 }
 0x357   :  { %v2008_v41 = vadd.f32 %v2006_v39, %v2005_v40 }
 0x359   :  { %3575 = vtanh.f32 %v2008_v41 }
 0x35a   :  { %3577 = vrcp.f32 %v2001_v42 }
 0x366   :  { %v3576_v47 = vpop.eup %3575 }
 0x367   :  { %v2010_v11 = vsub.f32 %v4358_v46, %v3576_v47  ;;  %v3578_v63 = vpop.eup %3577  ;;  %v4541_v46 = vld [vmem:[#allocation9 + $0x30] sm:$0xff] }
 0x369   :  { %v2011_v6 = vmul.f32 %v3578_v63, %v2010_v11  ;;  %v4573_v11 = vld [vmem:[#allocation9 + $0x178] sm:$0xff]  ;;  %v4579_v63 = vld [vmem:[#allocation9 + $0x160] sm:$0xff] }
 0x36b   :  { %v4433_v61 = vadd.f32 %v3576_v47, %v2011_v6  ;;  %v4585_v6 = vld [vmem:[#allocation9 + $0x148] sm:$0xff] }
 0x36d   :  { %2078 = vmatmul.mubr.f32.vlgmr.msra.gmra.mxu0 %v4433_v61  ;;  %3358 = vmatmul.mubr.f32.vlgmr.msra.gmra.mxu1 %v4433_v61 }
 0x36e   :  { %2182 = vmatpush1.msra.mxu0 %v4437_v2  ;;  %3361 = vmatpush3.msra.mxu1 %v4088_v48  ;;  %v4457_v48 = vld [vmem:[#allocation9 + $0x128] sm:$0xff] }
 0x36f   :  { %2183 = vmatprep.subr.mxu0 %v4441_v44  ;;  %3362 = vmatprep.subr.mxu1 %v4899_v3 }
 0x370   :  { %2184 = vmatpush1.msra.mxu0 %v4445_v45  ;;  %3363 = vmatpush3.msra.mxu1 %v4094_v49  ;;  %v4465_v49 = vld [vmem:[#allocation9 + $0x110] sm:$0xff] }
 0x371   :  { %2185 = vmatprep.subr.mxu0 %v4449_v43  ;;  %3364 = vmatprep.subr.mxu1 %v4899_v3 }
 0x372   :  { %2186 = vmatpush1.msra.mxu0 %v4453_v8  ;;  %3365 = vmatpush3.msra.mxu1 %v4101_v50  ;;  %v4473_v50 = vld [vmem:[#allocation9 + $0xf8] sm:$0xff] }
 0x373   :  { %2187 = vmatprep.subr.mxu0 %v4457_v48  ;;  %3366 = vmatprep.subr.mxu1 %v4899_v3 }
 0x374   :  { %2188 = vmatpush1.msra.mxu0 %v4461_v10  ;;  %3367 = vmatpush3.msra.mxu1 %v4107_v51  ;;  %v4481_v51 = vld [vmem:[#allocation9 + $0xe0] sm:$0xff] }
 0x375   :  { %2189 = vmatprep.subr.mxu0 %v4465_v49  ;;  %3368 = vmatprep.subr.mxu1 %v4899_v3 }
 0x376   :  { %2190 = vmatpush1.msra.mxu0 %v4469_v26  ;;  %3369 = vmatpush3.msra.mxu1 %v4113_v52  ;;  %v4489_v52 = vld [vmem:[#allocation9 + $0xc8] sm:$0xff] }
 0x377   :  { %2191 = vmatprep.subr.mxu0 %v4473_v50  ;;  %3370 = vmatprep.subr.mxu1 %v4899_v3 }
 0x378   :  { %2192 = vmatpush1.msra.mxu0 %v4477_v17  ;;  %3371 = vmatpush3.msra.mxu1 %v4119_v53  ;;  %v4497_v53 = vld [vmem:[#allocation9 + $0xb0] sm:$0xff] }
 0x379   :  { %2193 = vmatprep.subr.mxu0 %v4481_v51  ;;  %3372 = vmatprep.subr.mxu1 %v4899_v3 }
 0x37a   :  { %2194 = vmatpush1.msra.mxu0 %v4485_v5  ;;  %3373 = vmatpush3.msra.mxu1 %v4125_v54  ;;  %v4505_v54 = vld [vmem:[#allocation9 + $0x98] sm:$0xff] }
 0x37b   :  { %2195 = vmatprep.subr.mxu0 %v4489_v52  ;;  %3374 = vmatprep.subr.mxu1 %v4899_v3 }
 0x37c   :  { %2196 = vmatpush1.msra.mxu0 %v4493_v0  ;;  %3375 = vmatpush3.msra.mxu1 %v4131_v55  ;;  %v4513_v55 = vld [vmem:[#allocation9 + $0x80] sm:$0xff] }
 0x37d   :  { %2197 = vmatprep.subr.mxu0 %v4497_v53  ;;  %3376 = vmatprep.subr.mxu1 %v4899_v3 }
 0x37e   :  { %2198 = vmatpush1.msra.mxu0 %v4501_v12  ;;  %3377 = vmatpush3.msra.mxu1 %v4137_v56  ;;  %v4521_v56 = vld [vmem:[#allocation9 + $0x68] sm:$0xff] }
 0x37f   :  { %2199 = vmatprep.subr.mxu0 %v4505_v54  ;;  %3378 = vmatprep.subr.mxu1 %v4899_v3 }
 0x380   :  { %2200 = vmatpush1.msra.mxu0 %v4509_v13  ;;  %3379 = vmatpush3.msra.mxu1 %v4143_v57  ;;  %v4529_v57 = vld [vmem:[#allocation9 + $0x50] sm:$0xff] }
 0x381   :  { %2201 = vmatprep.subr.mxu0 %v4513_v55  ;;  %3380 = vmatprep.subr.mxu1 %v4899_v3 }
 0x382   :  { %2202 = vmatpush1.msra.mxu0 %v4517_v62  ;;  %3381 = vmatpush3.msra.mxu1 %v4149_v58  ;;  %v4537_v58 = vld [vmem:[#allocation9 + $0x38] sm:$0xff] }
 0x383   :  { %2203 = vmatprep.subr.mxu0 %v4521_v56  ;;  %3382 = vmatprep.subr.mxu1 %v4899_v3 }
 0x384   :  { %2204 = vmatpush1.msra.mxu0 %v4525_v9  ;;  %3383 = vmatpush3.msra.mxu1 %v4155_v59  ;;  %v4545_v59 = vld [vmem:[#allocation9 + $0x20] sm:$0xff] }
 0x385   :  { %2205 = vmatprep.subr.mxu0 %v4529_v57  ;;  %3384 = vmatprep.subr.mxu1 %v4899_v3 }
 0x386   :  { %2206 = vmatpush1.msra.mxu0 %v4533_v7  ;;  %3385 = vmatpush3.msra.mxu1 %v4161_v60  ;;  %v4553_v60 = vld [vmem:[#allocation9 + $0x8] sm:$0xff] }
 0x387   :  { %2207 = vmatprep.subr.mxu0 %v4537_v58  ;;  %3386 = vmatprep.subr.mxu1 %v4899_v3  ;;  %4916 = vst [vmem:[#allocation19_spill] sm:$0xff] %v4553_v60 }
 0x388   :  { %2208 = vmatpush1.msra.mxu0 %v4541_v46  ;;  %3387 = vmatpush3.msra.mxu1 %v4901_v1 }
 0x389   :  { %2209 = vmatprep.subr.mxu0 %v4545_v59  ;;  %3388 = vmatprep.subr.mxu1 %v4899_v3 }
 0x38a   :  { %2210 = vmatpush1.msra.mxu0 %v4549_v14  ;;  %3389 = vmatpush3.msra.mxu1 %v4910_v15  ;;  %v2154_v15 = vld [vmem:[#allocation3 + $0x12] sm:$0x3f] }
 0x38b   :  { %2211 = vmatprep.subr.mxu0 %v4553_v60  ;;  %3390 = vmatprep.subr.mxu1 %v4899_v3  ;;  %v2163_v27 = vrot.slane %v2154_v15, 2  ;;  %v2174_v35 = vrot.slane %v2154_v15, 4 }
 0x38c   :  { %2212 = vmatpush1.msra.mxu0 %v4557_v16  ;;  %2245 = vmatprep.mubr.f32.mxu0 %v4899_v3 }
 0x38d   :  { %3391 = vmatpush3.msra.mxu1 %v4913_v19  ;;  %3392 = vmatprep.mubr.msk.f32.mxu1 %vm3797_vm1, %v4899_v3 }
 0x38e   :  { %2349 = vmatprep.subr.mxu0 %v4427_v20  ;;  %3395 = vmatprep.subr.mxu1 %v4899_v3 }
 0x42d   :  { %v2079_v1 = vpop.f32.mrf.mxu0  ;;  %v2150_v18 = vpop.f32.mrf.mxu1 }
 0x42e   :  { %v2155_v21 = vadd.f32 %v2154_v15, %v2079_v1  ;;  %v2172_v33 = vadd.f32 %v4281_v4, %v2150_v18  ;;  %v4597_v1 = vld [vmem:[#allocation9 + $0x118] sm:$0xff]  ;;  %v4603_v15 = vld [vmem:[#allocation9 + $0x100] sm:$0xff]  ;;  %v4609_v18 = vld [vmem:[#allocation9 + $0xe8] sm:$0xff] }
 0x42f   :  { %v3359_v22 = vpop.f32.mrf.mxu1  ;;  %v2081_v25 = vpop.f32.mrf.mxu0 }
 0x430   :  { %v2156_v23 = vsub.f32 0.0, %v2155_v21  ;;  %v2165_v28 = vadd.f32 %v2163_v27, %v2081_v25  ;;  %v4615_v21 = vld [vmem:[#allocation9 + $0xd0] sm:$0xff]  ;;  %v4621_v22 = vld [vmem:[#allocation9 + $0xb8] sm:$0xff] }
 0x431   :  { %v4639_v25 = vld [vmem:[#allocation9 + $0x70] sm:$0xff]  ;;  %v4645_v27 = vld [vmem:[#allocation9 + $0x58] sm:$0xff] }
 0x432   :  { %v2157_v24 = vmul.f32 1.442695, %v2156_v23  ;;  %v2166_v29 = vsub.f32 0.0, %v2165_v28  ;;  %v4627_v23 = vld [vmem:[#allocation9 + $0xa0] sm:$0xff] }
 0x433   :  { %v4651_v28 = vld [vmem:[#allocation9 + $0x40] sm:$0xff] }
 0x434   :  { %3579 = vpow2.f32 %v2157_v24  ;;  %v2167_v19 = vmul.f32 1.442695, %v2166_v29  ;;  %v4633_v24 = vld [vmem:[#allocation9 + $0x88] sm:$0xff] }
 0x435   :  { %v4657_v29 = vld [vmem:[#allocation9 + $0x28] sm:$0xff] }
 0x436   :  { %3581 = vpow2.f32 %v2167_v19  ;;  %4918 = vst [vmem:[#allocation20_spill] sm:$0xff] %v4657_v29  ;;  %v4664_v19 = vld [vmem:[#allocation9 + $0x10] sm:$0xff] }
 0x437   :  { %4919 = vst [vmem:[#allocation24_spill] sm:$0xff] %v4664_v19 }
 0x441   :  { %v3580_v30 = vpop.eup %3579 }
 0x442   :  { %v2159_v31 = vadd.f32 1.0, %v3580_v30 }
 0x443   :  { %v3582_v32 = vpop.eup %3581 }
 0x444   :  { %3583 = vrcp.f32 %v2159_v31  ;;  %v2169_v38 = vadd.f32 1.0, %v3582_v32  ;;  %v2322_v31 = vld [vmem:[#allocation3 + $0x18] sm:$0x3f] }
 0x451   :  { %v3584_v34 = vpop.eup %3583 }
 0x452   :  { %v2173_v36 = vmul.f32 %v3584_v34, %v2172_v33 }
 0x454   :  { %v2176_v37 = vadd.f32 %v2174_v35, %v2173_v36 }
 0x456   :  { %3585 = vtanh.f32 %v2176_v37 }
 0x457   :  { %3587 = vrcp.f32 %v2169_v38  ;;  %v2331_v38 = vrot.slane %v2322_v31, 2 }
 0x463   :  { %v3586_v39 = vpop.eup %3585 }
 0x464   :  { %v2178_v40 = vsub.f32 %v4433_v61, %v3586_v39  ;;  %v3588_v41 = vpop.eup %3587  ;;  %v4591_v61 = vld [vmem:[#allocation9 + $0x130] sm:$0xff] }
 0x466   :  { %v2179_v42 = vmul.f32 %v3588_v41, %v2178_v40 }
 0x468   :  { %v4568_v47 = vadd.f32 %v3586_v39, %v2179_v42 }
 0x46a   :  { %2246 = vmatmul.mubr.f32.vlgmr.msra.gmra.mxu0 %v4568_v47  ;;  %3393 = vmatmul.mubr.f32.vlgmr.msra.gmra.mxu1 %v4568_v47 }
 0x46b   :  { %2350 = vmatpush1.msra.mxu0 %v4437_v2  ;;  %3396 = vmatpush3.msra.mxu1 %v4573_v11 }
 0x46c   :  { %2351 = vmatprep.subr.mxu0 %v4441_v44  ;;  %3397 = vmatprep.subr.mxu1 %v4899_v3 }
 0x46d   :  { %2352 = vmatpush1.msra.mxu0 %v4445_v45  ;;  %3398 = vmatpush3.msra.mxu1 %v4579_v63 }
 0x46e   :  { %2353 = vmatprep.subr.mxu0 %v4449_v43  ;;  %3399 = vmatprep.subr.mxu1 %v4899_v3 }
 0x46f   :  { %2354 = vmatpush1.msra.mxu0 %v4453_v8  ;;  %3400 = vmatpush3.msra.mxu1 %v4585_v6 }
 0x470   :  { %2355 = vmatprep.subr.mxu0 %v4457_v48  ;;  %3401 = vmatprep.subr.mxu1 %v4899_v3 }
 0x471   :  { %2356 = vmatpush1.msra.mxu0 %v4461_v10  ;;  %3402 = vmatpush3.msra.mxu1 %v4591_v61 }
 0x472   :  { %2357 = vmatprep.subr.mxu0 %v4465_v49  ;;  %3403 = vmatprep.subr.mxu1 %v4899_v3 }
 0x473   :  { %2358 = vmatpush1.msra.mxu0 %v4469_v26  ;;  %3404 = vmatpush3.msra.mxu1 %v4597_v1 }
 0x474   :  { %2359 = vmatprep.subr.mxu0 %v4473_v50  ;;  %3405 = vmatprep.subr.mxu1 %v4899_v3 }
 0x475   :  { %2360 = vmatpush1.msra.mxu0 %v4477_v17  ;;  %3406 = vmatpush3.msra.mxu1 %v4603_v15 }
 0x476   :  { %2361 = vmatprep.subr.mxu0 %v4481_v51  ;;  %3407 = vmatprep.subr.mxu1 %v4899_v3 }
 0x477   :  { %2362 = vmatpush1.msra.mxu0 %v4485_v5  ;;  %3408 = vmatpush3.msra.mxu1 %v4609_v18 }
 0x478   :  { %2363 = vmatprep.subr.mxu0 %v4489_v52  ;;  %3409 = vmatprep.subr.mxu1 %v4899_v3 }
 0x479   :  { %2364 = vmatpush1.msra.mxu0 %v4493_v0  ;;  %3410 = vmatpush3.msra.mxu1 %v4615_v21 }
 0x47a   :  { %2365 = vmatprep.subr.mxu0 %v4497_v53  ;;  %3411 = vmatprep.subr.mxu1 %v4899_v3 }
 0x47b   :  { %2366 = vmatpush1.msra.mxu0 %v4501_v12  ;;  %3412 = vmatpush3.msra.mxu1 %v4621_v22 }
 0x47c   :  { %2367 = vmatprep.subr.mxu0 %v4505_v54  ;;  %3413 = vmatprep.subr.mxu1 %v4899_v3 }
 0x47d   :  { %2368 = vmatpush1.msra.mxu0 %v4509_v13  ;;  %3414 = vmatpush3.msra.mxu1 %v4627_v23 }
 0x47e   :  { %2369 = vmatprep.subr.mxu0 %v4513_v55  ;;  %3415 = vmatprep.subr.mxu1 %v4899_v3 }
 0x47f   :  { %2370 = vmatpush1.msra.mxu0 %v4517_v62  ;;  %3416 = vmatpush3.msra.mxu1 %v4633_v24 }
 0x480   :  { %2371 = vmatprep.subr.mxu0 %v4521_v56  ;;  %3417 = vmatprep.subr.mxu1 %v4899_v3 }
 0x481   :  { %2372 = vmatpush1.msra.mxu0 %v4525_v9  ;;  %3418 = vmatpush3.msra.mxu1 %v4639_v25 }
 0x482   :  { %2373 = vmatprep.subr.mxu0 %v4529_v57  ;;  %3419 = vmatprep.subr.mxu1 %v4899_v3 }
 0x483   :  { %2374 = vmatpush1.msra.mxu0 %v4533_v7  ;;  %3420 = vmatpush3.msra.mxu1 %v4645_v27 }
 0x484   :  { %2375 = vmatprep.subr.mxu0 %v4537_v58  ;;  %3421 = vmatprep.subr.mxu1 %v4899_v3 }
 0x485   :  { %2376 = vmatpush1.msra.mxu0 %v4541_v46  ;;  %3422 = vmatpush3.msra.mxu1 %v4651_v28 }
 0x486   :  { %2377 = vmatprep.subr.mxu0 %v4545_v59  ;;  %3423 = vmatprep.subr.mxu1 %v4899_v3 }
 0x487   :  { %2378 = vmatpush1.msra.mxu0 %v4549_v14  ;;  %3424 = vmatpush3.msra.mxu1 %v4657_v29  ;;  %v2342_v29 = vrot.slane %v2322_v31, 4 }
 0x488   :  { %2379 = vmatprep.subr.mxu0 %v4553_v60  ;;  %3425 = vmatprep.subr.mxu1 %v4899_v3 }
 0x489   :  { %2380 = vmatpush1.msra.mxu0 %v4557_v16  ;;  %2413 = vmatprep.mubr.f32.mxu0 %v4899_v3 }
 0x48a   :  { %3426 = vmatpush3.msra.mxu1 %v4664_v19  ;;  %3427 = vmatprep.mubr.msk.f32.mxu1 %vm3797_vm1, %v4899_v3 }
 0x48b   :  { %2517 = vmatprep.subr.mxu0 %v4427_v20  ;;  %3430 = vmatprep.subr.mxu1 %v4899_v3 }
 0x52a   :  { %v2247_v30 = vpop.f32.mrf.mxu0  ;;  %v2318_v32 = vpop.f32.mrf.mxu1 }
 0x52b   :  { %v2323_v33 = vadd.f32 %v2322_v31, %v2247_v30  ;;  %v2340_v16 = vadd.f32 %v4281_v4, %v2318_v32  ;;  %v2490_v31 = vld [vmem:[#allocation3 + $0x1e] sm:$0x3f] }
 0x52c   :  { %v3394_v34 = vpop.f32.mrf.mxu1  ;;  %v2249_v37 = vpop.f32.mrf.mxu0 }
 0x52d   :  { %v2324_v35 = vsub.f32 0.0, %v2323_v33  ;;  %v2333_v39 = vadd.f32 %v2331_v38, %v2249_v37 }
 0x52f   :  { %v2325_v36 = vmul.f32 1.442695, %v2324_v35  ;;  %v2334_v40 = vsub.f32 0.0, %v2333_v39 }
 0x531   :  { %3589 = vpow2.f32 %v2325_v36  ;;  %v2335_v41 = vmul.f32 1.442695, %v2334_v40 }
 0x533   :  { %3591 = vpow2.f32 %v2335_v41 }
 0x53e   :  { %v3590_v42 = vpop.eup %3589 }
 0x53f   :  { %v2327_v19 = vadd.f32 1.0, %v3590_v42 }
 0x540   :  { %v3592_v20 = vpop.eup %3591 }
 0x541   :  { %3593 = vrcp.f32 %v2327_v19  ;;  %v2337_v34 = vadd.f32 1.0, %v3592_v20  ;;  %v4920_v20 = vld [vmem:[#allocation23_spill] sm:$0xff] }
 0x54e   :  { %v3594_v60 = vpop.eup %3593 }
 0x54f   :  { %v2341_v14 = vmul.f32 %v3594_v60, %v2340_v16  ;;  %v4922_v60 = vld [vmem:[#allocation19_spill] sm:$0xff]  ;;  %v4923_v16 = vld [vmem:[#allocation17_spill] sm:$0xff] }
 0x551   :  { %v2344_v30 = vadd.f32 %v2342_v29, %v2341_v14  ;;  %v4921_v14 = vld [vmem:[#allocation20_spill] sm:$0xff]  ;;  %v4925_v29 = vld [vmem:[#allocation18_spill] sm:$0xff] }
 0x553   :  { %3595 = vtanh.f32 %v2344_v30 }
 0x554   :  { %3597 = vrcp.f32 %v2337_v34  ;;  %v2499_v34 = vrot.slane %v2490_v31, 2 }
 0x560   :  { %v3596_v33 = vpop.eup %3595 }
 0x561   :  { %v2346_v35 = vsub.f32 %v4568_v47, %v3596_v33  ;;  %v3598_v36 = vpop.eup %3597  ;;  %v4924_v47 = vld [vmem:[#allocation24_spill] sm:$0xff] }
 0x563   :  { %v2347_v37 = vmul.f32 %v3598_v36, %v2346_v35 }
 0x565   :  { %v4673_v38 = vadd.f32 %v3596_v33, %v2347_v37 }
 0x567   :  { %2414 = vmatmul.mubr.f32.vlgmr.msra.gmra.mxu0 %v4673_v38  ;;  %3428 = vmatmul.mubr.f32.vlgmr.msra.gmra.mxu1 %v4673_v38 }
 0x568   :  { %2518 = vmatpush1.msra.mxu0 %v4437_v2  ;;  %3431 = vmatpush3.msra.mxu1 %v4573_v11 }
 0x569   :  { %2519 = vmatprep.subr.mxu0 %v4441_v44  ;;  %3432 = vmatprep.subr.mxu1 %v4899_v3 }
 0x56a   :  { %2520 = vmatpush1.msra.mxu0 %v4445_v45  ;;  %3433 = vmatpush3.msra.mxu1 %v4579_v63 }
 0x56b   :  { %2521 = vmatprep.subr.mxu0 %v4449_v43  ;;  %3434 = vmatprep.subr.mxu1 %v4899_v3 }
 0x56c   :  { %2522 = vmatpush1.msra.mxu0 %v4453_v8  ;;  %3435 = vmatpush3.msra.mxu1 %v4585_v6 }
 0x56d   :  { %2523 = vmatprep.subr.mxu0 %v4457_v48  ;;  %3436 = vmatprep.subr.mxu1 %v4899_v3 }
 0x56e   :  { %2524 = vmatpush1.msra.mxu0 %v4461_v10  ;;  %3437 = vmatpush3.msra.mxu1 %v4591_v61 }
 0x56f   :  { %2525 = vmatprep.subr.mxu0 %v4465_v49  ;;  %3438 = vmatprep.subr.mxu1 %v4899_v3 }
 0x570   :  { %2526 = vmatpush1.msra.mxu0 %v4469_v26  ;;  %3439 = vmatpush3.msra.mxu1 %v4597_v1 }
 0x571   :  { %2527 = vmatprep.subr.mxu0 %v4473_v50  ;;  %3440 = vmatprep.subr.mxu1 %v4899_v3 }
 0x572   :  { %2528 = vmatpush1.msra.mxu0 %v4477_v17  ;;  %3441 = vmatpush3.msra.mxu1 %v4603_v15 }
 0x573   :  { %2529 = vmatprep.subr.mxu0 %v4481_v51  ;;  %3442 = vmatprep.subr.mxu1 %v4899_v3 }
 0x574   :  { %2530 = vmatpush1.msra.mxu0 %v4485_v5  ;;  %3443 = vmatpush3.msra.mxu1 %v4609_v18 }
 0x575   :  { %2531 = vmatprep.subr.mxu0 %v4489_v52  ;;  %3444 = vmatprep.subr.mxu1 %v4899_v3 }
 0x576   :  { %2532 = vmatpush1.msra.mxu0 %v4493_v0  ;;  %3445 = vmatpush3.msra.mxu1 %v4615_v21 }
 0x577   :  { %2533 = vmatprep.subr.mxu0 %v4497_v53  ;;  %3446 = vmatprep.subr.mxu1 %v4899_v3 }
 0x578   :  { %2534 = vmatpush1.msra.mxu0 %v4501_v12  ;;  %3447 = vmatpush3.msra.mxu1 %v4621_v22 }
 0x579   :  { %2535 = vmatprep.subr.mxu0 %v4505_v54  ;;  %3448 = vmatprep.subr.mxu1 %v4899_v3 }
 0x57a   :  { %2536 = vmatpush1.msra.mxu0 %v4509_v13  ;;  %3449 = vmatpush3.msra.mxu1 %v4627_v23 }
 0x57b   :  { %2537 = vmatprep.subr.mxu0 %v4513_v55  ;;  %3450 = vmatprep.subr.mxu1 %v4899_v3 }
 0x57c   :  { %2538 = vmatpush1.msra.mxu0 %v4517_v62  ;;  %3451 = vmatpush3.msra.mxu1 %v4633_v24 }
 0x57d   :  { %2539 = vmatprep.subr.mxu0 %v4521_v56  ;;  %3452 = vmatprep.subr.mxu1 %v4899_v3 }
 0x57e   :  { %2540 = vmatpush1.msra.mxu0 %v4525_v9  ;;  %3453 = vmatpush3.msra.mxu1 %v4639_v25 }
 0x57f   :  { %2541 = vmatprep.subr.mxu0 %v4529_v57  ;;  %3454 = vmatprep.subr.mxu1 %v4899_v3 }
 0x580   :  { %2542 = vmatpush1.msra.mxu0 %v4533_v7  ;;  %3455 = vmatpush3.msra.mxu1 %v4645_v27 }
 0x581   :  { %2543 = vmatprep.subr.mxu0 %v4537_v58  ;;  %3456 = vmatprep.subr.mxu1 %v4899_v3 }
 0x582   :  { %2544 = vmatpush1.msra.mxu0 %v4541_v46  ;;  %3457 = vmatpush3.msra.mxu1 %v4651_v28 }
 0x583   :  { %2545 = vmatprep.subr.mxu0 %v4545_v59  ;;  %3458 = vmatprep.subr.mxu1 %v4899_v3 }
 0x584   :  { %2546 = vmatpush1.msra.mxu0 %v4920_v20  ;;  %3459 = vmatpush3.msra.mxu1 %v4921_v14  ;;  %v2510_v14 = vrot.slane %v2490_v31, 4 }
 0x585   :  { %2547 = vmatprep.subr.mxu0 %v4922_v60  ;;  %3460 = vmatprep.subr.mxu1 %v4899_v3 }
 0x586   :  { %2548 = vmatpush1.msra.mxu0 %v4923_v16  ;;  %2581 = vmatprep.mubr.f32.mxu0 %v4899_v3 }
 0x587   :  { %3461 = vmatpush3.msra.mxu1 %v4924_v47  ;;  %3462 = vmatprep.mubr.msk.f32.mxu1 %vm3797_vm1, %v4899_v3 }
 0x588   :  { %2685 = vmatprep.subr.mxu0 %v4925_v29  ;;  %3465 = vmatprep.subr.mxu1 %v4899_v3 }
 0x627   :  { %v2415_v19 = vpop.f32.mrf.mxu0  ;;  %v2486_v32 = vpop.f32.mrf.mxu1 }
 0x628   :  { %v2491_v39 = vadd.f32 %v2490_v31, %v2415_v19  ;;  %v2508_v16 = vadd.f32 %v4281_v4, %v2486_v32  ;;  %v4926_v4 = vld [vmem:[#allocation23_spill] sm:$0xff]  ;;  %v2826_v31 = vld [vmem:[#allocation3 + $0x2a] sm:$0x3f] }
 0x629   :  { %v3429_v40 = vpop.f32.mrf.mxu1  ;;  %v2417_v30 = vpop.f32.mrf.mxu0 }
 0x62a   :  { %v2492_v41 = vsub.f32 0.0, %v2491_v39  ;;  %v2501_v33 = vadd.f32 %v2499_v34, %v2417_v30 }
 0x62c   :  { %v2493_v42 = vmul.f32 1.442695, %v2492_v41  ;;  %v2502_v35 = vsub.f32 0.0, %v2501_v33 }
 0x62e   :  { %3599 = vpow2.f32 %v2493_v42  ;;  %v2503_v36 = vmul.f32 1.442695, %v2502_v35 }
 0x630   :  { %3601 = vpow2.f32 %v2503_v36 }
 0x63b   :  { %v3600_v37 = vpop.eup %3599 }
 0x63c   :  { %v2495_v47 = vadd.f32 1.0, %v3600_v37 }
 0x63d   :  { %v3602_v29 = vpop.eup %3601 }
 0x63e   :  { %3603 = vrcp.f32 %v2495_v47  ;;  %v2505_v40 = vadd.f32 1.0, %v3602_v29 }
 0x64b   :  { %v3604_v60 = vpop.eup %3603 }
 0x64c   :  { %v2509_v20 = vmul.f32 %v3604_v60, %v2508_v16  ;;  %v2859_v60 = vld [vmem:[#allocation10 + $0x8] sm:$0xff]  ;;  %v2858_v16 = vld [vmem:[#allocation10] sm:$0xff] }
 0x64e   :  { %v2512_v19 = vadd.f32 %v2510_v14, %v2509_v20  ;;  %v2861_v20 = vld [vmem:[#allocation10 + $0x18] sm:$0xff]  ;;  %v2860_v14 = vld [vmem:[#allocation10 + $0x10] sm:$0xff] }
 0x650   :  { %3605 = vtanh.f32 %v2512_v19  ;;  %v2835_v19 = vrot.slane %v2826_v31, 2 }
 0x651   :  { %3607 = vrcp.f32 %v2505_v40 }
 0x65d   :  { %v3606_v39 = vpop.eup %3605 }
 0x65e   :  { %v2514_v41 = vsub.f32 %v4673_v38, %v3606_v39  ;;  %v3608_v42 = vpop.eup %3607  ;;  %v2862_v38 = vld [vmem:[#allocation10 + $0x20] sm:$0xff] }
 0x660   :  { %v2515_v30 = vmul.f32 %v3608_v42, %v2514_v41 }
 0x662   :  { %v4746_v34 = vadd.f32 %v3606_v39, %v2515_v30 }
 0x664   :  { %2582 = vmatmul.mubr.f32.vlgmr.msra.gmra.mxu0 %v4746_v34  ;;  %3463 = vmatmul.mubr.f32.vlgmr.msra.gmra.mxu1 %v4746_v34 }
 0x665   :  { %2686 = vmatpush1.msra.mxu0 %v4437_v2  ;;  %3466 = vmatpush3.msra.mxu1 %v4573_v11  ;;  %v4927_v2 = vld [vmem:[#allocation20_spill] sm:$0xff] }
 0x666   :  { %2687 = vmatprep.subr.mxu0 %v4441_v44  ;;  %3467 = vmatprep.subr.mxu1 %v4899_v3  ;;  %v4928_v44 = vld [vmem:[#allocation19_spill] sm:$0xff] }
 0x667   :  { %2688 = vmatpush1.msra.mxu0 %v4445_v45  ;;  %3468 = vmatpush3.msra.mxu1 %v4579_v63  ;;  %v4929_v45 = vld [vmem:[#allocation17_spill] sm:$0xff] }
 0x668   :  { %2689 = vmatprep.subr.mxu0 %v4449_v43  ;;  %3469 = vmatprep.subr.mxu1 %v4899_v3  ;;  %v4930_v43 = vld [vmem:[#allocation24_spill] sm:$0xff] }
 0x669   :  { %2690 = vmatpush1.msra.mxu0 %v4453_v8  ;;  %3470 = vmatpush3.msra.mxu1 %v4585_v6 }
 0x66a   :  { %2691 = vmatprep.subr.mxu0 %v4457_v48  ;;  %3471 = vmatprep.subr.mxu1 %v4899_v3  ;;  %v2658_v48 = vld [vmem:[#allocation3 + $0x24] sm:$0x3f] }
 0x66b   :  { %2692 = vmatpush1.msra.mxu0 %v4461_v10  ;;  %3472 = vmatpush3.msra.mxu1 %v4591_v61  ;;  %v2873_v61 = vld [vmem:[#allocation10 + $0x78] sm:$0xff] }
 0x66c   :  { %2693 = vmatprep.subr.mxu0 %v4465_v49  ;;  %3473 = vmatprep.subr.mxu1 %v4899_v3 }
 0x66d   :  { %2694 = vmatpush1.msra.mxu0 %v4469_v26  ;;  %3474 = vmatpush3.msra.mxu1 %v4597_v1  ;;  %v2872_v1 = vld [vmem:[#allocation10 + $0x70] sm:$0xff] }
 0x66e   :  { %2695 = vmatprep.subr.mxu0 %v4473_v50  ;;  %3475 = vmatprep.subr.mxu1 %v4899_v3 }
 0x66f   :  { %2696 = vmatpush1.msra.mxu0 %v4477_v17  ;;  %3476 = vmatpush3.msra.mxu1 %v4603_v15  ;;  %v2871_v15 = vld [vmem:[#allocation10 + $0x68] sm:$0xff] }
 0x670   :  { %2697 = vmatprep.subr.mxu0 %v4481_v51  ;;  %3477 = vmatprep.subr.mxu1 %v4899_v3 }
 0x671   :  { %2698 = vmatpush1.msra.mxu0 %v4485_v5  ;;  %3478 = vmatpush3.msra.mxu1 %v4609_v18  ;;  %v2667_v5 = vrot.slane %v2658_v48, 2  ;;  %v2870_v18 = vld [vmem:[#allocation10 + $0x60] sm:$0xff] }
 0x672   :  { %2699 = vmatprep.subr.mxu0 %v4489_v52  ;;  %3479 = vmatprep.subr.mxu1 %v4899_v3 }
 0x673   :  { %2700 = vmatpush1.msra.mxu0 %v4493_v0  ;;  %3480 = vmatpush3.msra.mxu1 %v4615_v21  ;;  %v2869_v21 = vld [vmem:[#allocation10 + $0x58] sm:$0xff] }
 0x674   :  { %2701 = vmatprep.subr.mxu0 %v4497_v53  ;;  %3481 = vmatprep.subr.mxu1 %v4899_v3 }
 0x675   :  { %2702 = vmatpush1.msra.mxu0 %v4501_v12  ;;  %3482 = vmatpush3.msra.mxu1 %v4621_v22  ;;  %v2868_v22 = vld [vmem:[#allocation10 + $0x50] sm:$0xff] }
 0x676   :  { %2703 = vmatprep.subr.mxu0 %v4505_v54  ;;  %3483 = vmatprep.subr.mxu1 %v4899_v3 }
 0x677   :  { %2704 = vmatpush1.msra.mxu0 %v4509_v13  ;;  %3484 = vmatpush3.msra.mxu1 %v4627_v23  ;;  %v2867_v23 = vld [vmem:[#allocation10 + $0x48] sm:$0xff] }
 0x678   :  { %2705 = vmatprep.subr.mxu0 %v4513_v55  ;;  %3485 = vmatprep.subr.mxu1 %v4899_v3  ;;  %v4819_v55 = vld [vmem:[%s4856_s4] ss:$0 sm:$0xff] }
 0x679   :  { %2706 = vmatpush1.msra.mxu0 %v4517_v62  ;;  %3486 = vmatpush3.msra.mxu1 %v4633_v24  ;;  %v2866_v24 = vld [vmem:[#allocation10 + $0x40] sm:$0xff] }
 0x67a   :  { %2707 = vmatprep.subr.mxu0 %v4521_v56  ;;  %3487 = vmatprep.subr.mxu1 %v4899_v3 }
 0x67b   :  { %2708 = vmatpush1.msra.mxu0 %v4525_v9  ;;  %3488 = vmatpush3.msra.mxu1 %v4639_v25  ;;  %v2678_v9 = vrot.slane %v2658_v48, 4  ;;  %v2865_v25 = vld [vmem:[#allocation10 + $0x38] sm:$0xff] }
 0x67c   :  { %2709 = vmatprep.subr.mxu0 %v4529_v57  ;;  %3489 = vmatprep.subr.mxu1 %v4899_v3 }
 0x67d   :  { %2710 = vmatpush1.msra.mxu0 %v4533_v7  ;;  %3490 = vmatpush3.msra.mxu1 %v4645_v27  ;;  %v2864_v27 = vld [vmem:[#allocation10 + $0x30] sm:$0xff] }
 0x67e   :  { %2711 = vmatprep.subr.mxu0 %v4537_v58  ;;  %3491 = vmatprep.subr.mxu1 %v4899_v3 }
 0x67f   :  { %2712 = vmatpush1.msra.mxu0 %v4541_v46  ;;  %3492 = vmatpush3.msra.mxu1 %v4651_v28  ;;  %v2863_v28 = vld [vmem:[#allocation10 + $0x28] sm:$0xff] }
 0x680   :  { %2713 = vmatprep.subr.mxu0 %v4545_v59  ;;  %3493 = vmatprep.subr.mxu1 %v4899_v3 }
 0x681   :  { %2714 = vmatpush1.msra.mxu0 %v4926_v4  ;;  %3494 = vmatpush3.msra.mxu1 %v4927_v2  ;;  %v2846_v2 = vrot.slane %v2826_v31, 4 }
 0x682   :  { %2715 = vmatprep.subr.mxu0 %v4928_v44  ;;  %3495 = vmatprep.subr.mxu1 %v4899_v3 }
 0x683   :  { %2716 = vmatpush1.msra.mxu0 %v4929_v45  ;;  %2749 = vmatprep.mubr.f32.mxu0 %v4899_v3 }
 0x684   :  { %3496 = vmatpush3.msra.mxu1 %v4930_v43  ;;  %3497 = vmatprep.mubr.msk.f32.mxu1 %vm3797_vm1, %v4899_v3 }
 0x685   :  { %3500 = vmatprep.subr.mxu0 %v4899_v3 }
 0x724   :  { %v2583_v8 = vpop.f32.mrf.mxu0  ;;  %v2654_v10 = vpop.f32.mrf.mxu1 }
 0x725   :  { %v2659_v49 = vadd.f32 %v2658_v48, %v2583_v8  ;;  %v2676_v62 = vadd.f32 %v4819_v55, %v2654_v10 }
 0x726   :  { %v3464_v26 = vpop.f32.mrf.mxu1  ;;  %v2585_v51 = vpop.f32.mrf.mxu0 }
 0x727   :  { %v2660_v50 = vsub.f32 0.0, %v2659_v49  ;;  %v2669_v52 = vadd.f32 %v2667_v5, %v2585_v51 }
 0x729   :  { %v2661_v17 = vmul.f32 1.442695, %v2660_v50  ;;  %v2670_v0 = vsub.f32 0.0, %v2669_v52 }
 0x72b   :  { %3609 = vpow2.f32 %v2661_v17  ;;  %v2671_v53 = vmul.f32 1.442695, %v2670_v0  ;;  %v2986_v17 = vld [vmem:[%s4858_s6] ss:$0 sm:$0xff] }
 0x72d   :  { %3611 = vpow2.f32 %v2671_v53 }
 0x738   :  { %v3610_v12 = vpop.eup %3609 }
 0x739   :  { %v2663_v54 = vadd.f32 1.0, %v3610_v12 }
 0x73a   :  { %v3612_v13 = vpop.eup %3611 }
 0x73b   :  { %3613 = vrcp.f32 %v2663_v54  ;;  %v2673_v58 = vadd.f32 1.0, %v3612_v13 }
 0x748   :  { %v3614_v56 = vpop.eup %3613 }
 0x749   :  { %v2677_v57 = vmul.f32 %v3614_v56, %v2676_v62 }
 0x74b   :  { %v2680_v7 = vadd.f32 %v2678_v9, %v2677_v57 }
 0x74d   :  { %3615 = vtanh.f32 %v2680_v7 }
 0x74e   :  { %3617 = vrcp.f32 %v2673_v58 }
 0x75a   :  { %v3616_v46 = vpop.eup %3615 }
 0x75b   :  { %v2682_v59 = vsub.f32 %v4746_v34, %v3616_v46  ;;  %v3618_v11 = vpop.eup %3617 }
 0x75d   :  { %v2683_v63 = vmul.f32 %v3618_v11, %v2682_v59 }
 0x75f   :  { %v4823_v6 = vadd.f32 %v3616_v46, %v2683_v63 }
 0x761   :  { %2750 = vmatmul.mubr.f32.vlgmr.msra.gmra.mxu0 %v4823_v6  ;;  %3498 = vmatmul.mubr.f32.vlgmr.msra.gmra.mxu1 %v4823_v6 }
 0x762   :  { %3532 = vmatprep.mubr.msk.f32.mxu0 %vm3797_vm1, %v4899_v3  ;;  %3501 = vmatpush3.msra.mxu0 %v2873_v61 }
 0x763   :  { %3502 = vmatprep.subr.mxu0 %v4899_v3 }
 0x764   :  { %3503 = vmatpush3.msra.mxu0 %v2872_v1 }
 0x765   :  { %3504 = vmatprep.subr.mxu0 %v4899_v3 }
 0x766   :  { %3505 = vmatpush3.msra.mxu0 %v2871_v15 }
 0x767   :  { %3506 = vmatprep.subr.mxu0 %v4899_v3 }
 0x768   :  { %3507 = vmatpush3.msra.mxu0 %v2870_v18 }
 0x769   :  { %3508 = vmatprep.subr.mxu0 %v4899_v3 }
 0x76a   :  { %3509 = vmatpush3.msra.mxu0 %v2869_v21 }
 0x76b   :  { %3510 = vmatprep.subr.mxu0 %v4899_v3 }
 0x76c   :  { %3511 = vmatpush3.msra.mxu0 %v2868_v22 }
 0x76d   :  { %3512 = vmatprep.subr.mxu0 %v4899_v3 }
 0x76e   :  { %3513 = vmatpush3.msra.mxu0 %v2867_v23 }
 0x76f   :  { %3514 = vmatprep.subr.mxu0 %v4899_v3 }
 0x770   :  { %3515 = vmatpush3.msra.mxu0 %v2866_v24 }
 0x771   :  { %3516 = vmatprep.subr.mxu0 %v4899_v3 }
 0x772   :  { %3517 = vmatpush3.msra.mxu0 %v2865_v25 }
 0x773   :  { %3518 = vmatprep.subr.mxu0 %v4899_v3 }
 0x774   :  { %3519 = vmatpush3.msra.mxu0 %v2864_v27 }
 0x775   :  { %3520 = vmatprep.subr.mxu0 %v4899_v3 }
 0x776   :  { %3521 = vmatpush3.msra.mxu0 %v2863_v28 }
 0x777   :  { %3522 = vmatprep.subr.mxu0 %v4899_v3 }
 0x778   :  { %3523 = vmatpush3.msra.mxu0 %v2862_v38 }
 0x779   :  { %3524 = vmatprep.subr.mxu0 %v4899_v3 }
 0x77a   :  { %3525 = vmatpush3.msra.mxu0 %v2861_v20 }
 0x77b   :  { %3526 = vmatprep.subr.mxu0 %v4899_v3 }
 0x77c   :  { %3527 = vmatpush3.msra.mxu0 %v2860_v14 }
 0x77d   :  { %3528 = vmatprep.subr.mxu0 %v4899_v3 }
 0x77e   :  { %3529 = vmatpush3.msra.mxu0 %v2859_v60 }
 0x77f   :  { %3530 = vmatprep.subr.mxu0 %v4899_v3 }
 0x780   :  { %3531 = vmatpush3.msra.mxu0 %v2858_v16 }
 0x821   :  { %v2751_v47 = vpop.f32.mrf.mxu0  ;;  %v2822_v32 = vpop.f32.mrf.mxu1 }
 0x822   :  { %v2827_v33 = vadd.f32 %v2826_v31, %v2751_v47  ;;  %v2844_v3 = vadd.f32 %v4819_v55, %v2822_v32 }
 0x823   :  { %v3499_v35 = vpop.f32.mrf.mxu1  ;;  %v2753_v29 = vpop.f32.mrf.mxu0 }
 0x824   :  { %v2828_v36 = vsub.f32 0.0, %v2827_v33  ;;  %v2837_v40 = vadd.f32 %v2835_v19, %v2753_v29 }
 0x826   :  { %v2829_v37 = vmul.f32 1.442695, %v2828_v36  ;;  %v2838_v39 = vsub.f32 0.0, %v2837_v40 }
 0x828   :  { %3619 = vpow2.f32 %v2829_v37  ;;  %v2839_v41 = vmul.f32 1.442695, %v2838_v39 }
 0x82a   :  { %3621 = vpow2.f32 %v2839_v41 }
 0x835   :  { %v3620_v42 = vpop.eup %3619 }
 0x836   :  { %v2831_v30 = vadd.f32 1.0, %v3620_v42 }
 0x837   :  { %v3622_v34 = vpop.eup %3621 }
 0x838   :  { %3623 = vrcp.f32 %v2831_v30  ;;  %v2841_v43 = vadd.f32 1.0, %v3622_v34 }
 0x845   :  { %v3624_v4 = vpop.eup %3623 }
 0x846   :  { %v2845_v44 = vmul.f32 %v3624_v4, %v2844_v3 }
 0x848   :  { %v2848_v45 = vadd.f32 %v2846_v2, %v2845_v44 }
 0x84a   :  { %3625 = vtanh.f32 %v2848_v45 }
 0x84b   :  { %3627 = vrcp.f32 %v2841_v43 }
 0x857   :  { %v3626_v8 = vpop.eup %3625 }
 0x858   :  { %v2850_v48 = vsub.f32 %v4823_v6, %v3626_v8  ;;  %v3628_v10 = vpop.eup %3627 }
 0x85a   :  { %v2851_v49 = vmul.f32 %v3628_v10, %v2850_v48 }
 0x85c   :  { %v2852_v26 = vadd.f32 %v3626_v8, %v2851_v49 }
 0x85e   :  { %2853 = vst [vmem:[#allocation2] sm:$0x3] %v2852_v26 }
 0x865   :  { %v2857_v50 = vld [vmem:[#allocation2] sm:$0x3] }
 0x866   :  { %3533 = vmatmul.mubr.f32.vlgmr.msra.gmra.mxu0 %v2857_v50 }
 0x926   :  { %v2947_v51 = vpop.f32.mrf.mxu0 }
 0x927   :  { %v2948_v5 = vadd.f32 %v2986_v17, %v2947_v51 }
 0x928   :  { %v3534_v52 = vpop.f32.mrf.mxu0 }
 0x929   :  { %2951 = vst [vmem:[#allocation12] sm:$0x3] %v2948_v5 }
 0x92a   :  { %3769 = shalt.err (!%p3766_p10)
}
 0x92b   :  { %2961 = dma.vmem_to_hbm [thread:$0]  %s2959_s30, 32, %s4859_s7, [#allocation6]  }
 0x92c   :  { %3784 = dma.done.wait [#allocation6], 32  }
 0x92d   :  { %3785 = vsyncadd [#allocation6], 4294967264 }
 0x92e   :  { %2965 = vsyncpa [#allocation5], 1 }
 0x92f   :  { %2966 = vsyncpa [#allocation8], 1 }
 0x930   :  { %2967 = vsyncpa [#allocation11], 1 }
 0x931   :  { %2968 = vsyncpa [#allocation6], 1 }

</bundles_post_ra>
